<compile_context>
chip_gen: v7x
topology: tpu7x:2x2x1
jax: 0.10.0
libtpu: 0.0.40
codegen_flags: <defaults>
</compile_context>

<pallas_src>
import functools

import jax
import jax.numpy as jnp
from jax.experimental import pallas as pl
from jax.experimental.pallas import tpu as pltpu


def _resident_spec(shape):
    nd = len(shape)
    return pl.BlockSpec(shape, lambda n, _nd=nd: (0,) * _nd)


# --------------------------------- kernels ---------------------------------

def _make_block_kernel_s1(H, W, has_down):
    """Whole ResidualBlock, stride 1.  One image per grid step."""

    def kernel(x_ref, w1_ref, b1_ref, w2_ref, b2_ref, w3_ref, b3_ref, *rest):
        if has_down:
            wd_ref, bd_ref, o_ref, h1pad_ref = rest
        else:
            o_ref, h1pad_ref = rest
        cmid = w1_ref.shape[1]

        x = x_ref[0]                                           # (H*W, Cin) bf16
        # conv1 (1x1) + folded BN1 + ReLU
        h1 = jnp.dot(x, w1_ref[...], preferred_element_type=jnp.float32)
        h1 = jnp.maximum(h1 + b1_ref[...], 0.0)
        # zero-padded copy of h1 in VMEM for the 3x3 window reads
        h1pad_ref[...] = jnp.zeros_like(h1pad_ref)
        h1pad_ref[1:H + 1, 1:W + 1, :] = h1.reshape(H, W, cmid)

        # conv2 (3x3, stride 1, pad 1) + folded BN2: 9 shifted-window matmuls,
        # accumulated in a local f32 value (kept in vregs by the compiler).
        acc = jnp.zeros((H * W, w2_ref.shape[2]), jnp.float32)
        for dy in range(3):
            for dx in range(3):
                slab = h1pad_ref[dy:dy + H, dx:dx + W, :]
                slab = slab.reshape(H * W, cmid).astype(jnp.bfloat16)
                acc = acc + jnp.dot(slab, w2_ref[3 * dy + dx],
                                    preferred_element_type=jnp.float32)
        h2 = jnp.maximum(acc + b2_ref[...], 0.0).astype(jnp.bfloat16)

        # conv3 (1x1) + folded BN3
        h3 = jnp.dot(h2, w3_ref[...], preferred_element_type=jnp.float32)
        h3 = h3 + b3_ref[...]

        # shortcut
        if has_down:
            res = jnp.dot(x, wd_ref[...], preferred_element_type=jnp.float32)
            res = res + bd_ref[...]
        else:
            res = x.astype(jnp.float32)

        o_ref[0] = jnp.maximum(h3 + res, 0.0)

    return kernel


def _make_block_kernel_s2(Hh, Wh):
    """Whole ResidualBlock, stride 2 (always has the projection shortcut).

    The wrapper delivers x split into its 4 spatial phases (row/col parity),
    so the 1x1 convs and all 9 stride-2 window reads are contiguous slices:
    h1 row 2*ho + dy - 1 lives in phase (dy+1) % 2 at padded offset (dy+1)//2.
    """

    def kernel(x_ref, w1_ref, b1_ref, w2_ref, b2_ref, w3_ref, b3_ref,
               wd_ref, bd_ref, o_ref, h1pad_ref):
        cin = w1_ref.shape[0]
        cmid = w1_ref.shape[1]

        # conv1 (1x1) + BN1 + ReLU over all 4 phases in a single matmul
        # (1x1 conv commutes with spatial subsampling), stashed zero-padded
        # per phase in VMEM.
        xall = x_ref[0].reshape(4 * Hh * Wh, cin)              # bf16
        h = jnp.dot(xall, w1_ref[...], preferred_element_type=jnp.float32)
        h = jnp.maximum(h + b1_ref[...], 0.0)
        h4 = h.reshape(4, Hh, Wh, cmid)
        h1pad_ref[...] = jnp.zeros_like(h1pad_ref)
        for p in range(4):
            h1pad_ref[p, 1:Hh + 1, 1:Wh + 1, :] = h4[p]

        # conv2 (3x3, stride 2, pad 1) + BN2: 9 shifted-window matmuls,
        # accumulated in a local f32 value.
        acc = jnp.zeros((Hh * Wh, w2_ref.shape[2]), jnp.float32)
        for dy in range(3):
            py, oy = (dy + 1) % 2, (dy + 1) // 2
            for dx in range(3):
                px, ox = (dx + 1) % 2, (dx + 1) // 2
                slab = h1pad_ref[2 * py + px, oy:oy + Hh, ox:ox + Wh, :]
                slab = slab.reshape(Hh * Wh, cmid).astype(jnp.bfloat16)
                acc = acc + jnp.dot(slab, w2_ref[3 * dy + dx],
                                    preferred_element_type=jnp.float32)
        h2 = jnp.maximum(acc + b2_ref[...], 0.0).astype(jnp.bfloat16)

        # conv3 (1x1) + BN3
        h3 = jnp.dot(h2, w3_ref[...], preferred_element_type=jnp.float32)
        h3 = h3 + b3_ref[...]

        # projection shortcut: 1x1 stride-2 conv == 1x1 conv on phase (0, 0)
        res = jnp.dot(x_ref[0, 0], wd_ref[...], preferred_element_type=jnp.float32)
        res = res + bd_ref[...]

        o_ref[0] = jnp.maximum(h3 + res, 0.0)

    return kernel


# --------------------------------- wrapper ----------------------------------

@functools.partial(jax.jit, static_argnames="stride")
def residual_block_forward(x_nchw, params, *, stride):
    """y = ResidualBlock(x).  x_nchw: (N, Cin, H, W) f32 -> (N, 2*Cout, Ho, Wo) f32."""
    w1, b1 = params["w1"], params["b1"]
    w2, b2 = params["w2"], params["b2"]
    w3, b3 = params["w3"], params["b3"]
    cin, cmid = w1.shape
    cout = w3.shape[1]
    N, C, H, W = x_nchw.shape
    assert C == cin
    assert stride in (1, 2)  # TODO(synk): general strides need strided-window reads

    x = jnp.transpose(x_nchw, (0, 2, 3, 1)).astype(jnp.bfloat16)   # NHWC, bf16
    has_down = (stride != 1) or (cin != cout)

    weights = [w1, b1, w2, b2, w3, b3]
    if has_down:
        weights += [params["wd"], params["bd"]]

    if stride == 1:
        Ho, Wo = H, W
        x_in = x.reshape(N, H * W, cin)
        x_spec = pl.BlockSpec((1, H * W, cin), lambda n: (n, 0, 0))
        kernel = _make_block_kernel_s1(H, W, has_down)
        scratch = [pltpu.VMEM((H + 2, W + 2, cmid), jnp.float32)]
    else:
        assert H % 2 == 0 and W % 2 == 0
        Hh, Wh = H // 2, W // 2
        Ho, Wo = Hh, Wh
        # split x into its 4 spatial phases: index 2*(h%2) + (w%2)
        x_in = jnp.transpose(x.reshape(N, Hh, 2, Wh, 2, cin),
                             (0, 2, 4, 1, 3, 5)).reshape(N, 4, Hh * Wh, cin)
        x_spec = pl.BlockSpec((1, 4, Hh * Wh, cin), lambda n: (n, 0, 0, 0))
        kernel = _make_block_kernel_s2(Hh, Wh)
        scratch = [pltpu.VMEM((4, Hh + 2, Wh + 2, cmid), jnp.float32)]

    out = pl.pallas_call(
        kernel,
        out_shape=jax.ShapeDtypeStruct((N, Ho * Wo, cout), jnp.float32),
        grid=(N,),
        in_specs=[x_spec] + [_resident_spec(w.shape) for w in weights],
        out_specs=pl.BlockSpec((1, Ho * Wo, cout), lambda n: (n, 0, 0)),
        scratch_shapes=scratch,
        compiler_params=pltpu.CompilerParams(dimension_semantics=("parallel",)),
    )(x_in, *weights)

    return jnp.transpose(out.reshape(N, Ho, Wo, cout), (0, 3, 1, 2))


# ----------------------- deterministic parameter init -----------------------

def _folded_bn(key, c):
    kg, kb, km, kv = jax.random.split(key, 4)
    gamma = 1.0 + 0.1 * jax.random.normal(kg, (c,), jnp.float32)
    beta = 0.1 * jax.random.normal(kb, (c,), jnp.float32)
    mean = 0.1 * jax.random.normal(km, (c,), jnp.float32)
    var = 1.0 + 0.1 * jnp.abs(jax.random.normal(kv, (c,), jnp.float32))
    scale = gamma * jax.lax.rsqrt(var + 1e-5)
    return scale, beta - mean * scale


def init_residual_block_params(key, in_channels, out_channels):
    """BN (inference) scale pre-folded into bf16 conv weights; biases stay f32."""
    c2 = 2 * out_channels
    k1, k2, k3, kd, kb1, kb2, kb3, kbd = jax.random.split(key, 8)
    s1, b1 = _folded_bn(kb1, out_channels)
    s2, b2 = _folded_bn(kb2, out_channels)
    s3, b3 = _folded_bn(kb3, c2)
    sd, bd = _folded_bn(kbd, c2)
    w1 = jax.random.normal(k1, (in_channels, out_channels), jnp.float32) * in_channels ** -0.5
    w2 = jax.random.normal(k2, (9, out_channels, out_channels), jnp.float32) * (9 * out_channels) ** -0.5
    w3 = jax.random.normal(k3, (out_channels, c2), jnp.float32) * out_channels ** -0.5
    wd = jax.random.normal(kd, (in_channels, c2), jnp.float32) * in_channels ** -0.5
    return {
        "w1": (w1 * s1[None, :]).astype(jnp.bfloat16), "b1": b1.reshape(1, -1),
        "w2": (w2 * s2[None, None, :]).astype(jnp.bfloat16), "b2": b2.reshape(1, -1),
        "w3": (w3 * s3[None, :]).astype(jnp.bfloat16), "b3": b3.reshape(1, -1),
        "wd": (wd * sd[None, :]).astype(jnp.bfloat16), "bd": bd.reshape(1, -1),
    }


# ------------------------------ pure-JAX reference ---------------------------

def reference_forward(x_nchw, params, stride):
    """Independent reference (same bf16 operand rounding, f32 accumulation)."""
    hi = jax.lax.Precision.HIGHEST
    f32 = lambda a: a.astype(jnp.float32)
    x = f32(jnp.transpose(x_nchw, (0, 2, 3, 1)).astype(jnp.bfloat16))
    h1 = jax.nn.relu(jnp.einsum("nhwc,cd->nhwd", x, f32(params["w1"]),
                                precision=hi) + params["b1"][0])
    h1 = f32(h1.astype(jnp.bfloat16))
    cmid = params["w2"].shape[1]
    k2 = f32(params["w2"]).reshape(3, 3, cmid, cmid)
    h2 = jax.lax.conv_general_dilated(
        h1, k2, window_strides=(stride, stride), padding=((1, 1), (1, 1)),
        dimension_numbers=("NHWC", "HWIO", "NHWC"), precision=hi)
    h2 = f32(jax.nn.relu(h2 + params["b2"][0]).astype(jnp.bfloat16))
    h3 = jnp.einsum("nhwc,cd->nhwd", h2, f32(params["w3"]), precision=hi) + params["b3"][0]
    cin, cout = params["w1"].shape[0], params["w3"].shape[1]
    if stride != 1 or cin != cout:
        res = jnp.einsum("nhwc,cd->nhwd", x[:, ::stride, ::stride, :],
                         f32(params["wd"]), precision=hi) + params["bd"][0]
    else:
        res = x
    return jnp.transpose(jax.nn.relu(h3 + res), (0, 3, 1, 2))


if __name__ == "__main__":
    key = jax.random.PRNGKey(0)
    kx, kp_a, kp_b = jax.random.split(key, 3)

    # projection-shortcut block: in=32, out=64, stride=2, 16x16 -> (2, 128, 8, 8)
    x = jax.random.normal(kx, (2, 32, 16, 16), jnp.float32)
    params_a = init_residual_block_params(kp_a, 32, 64)
    y_a = jax.block_until_ready(residual_block_forward(x, params_a, stride=2))
    assert y_a.shape == (2, 128, 8, 8), y_a.shape
    assert bool(jnp.all(jnp.isfinite(y_a)))
    ref_a = reference_forward(x, params_a, 2)
    assert bool(jnp.allclose(y_a, ref_a, rtol=5e-2, atol=5e-2)), \
        float(jnp.max(jnp.abs(y_a - ref_a)))

    # identity-shortcut block: in == 2*out, stride=1 -> (2, 128, 8, 8)
    params_b = init_residual_block_params(kp_b, 128, 64)
    y_b = jax.block_until_ready(residual_block_forward(y_a, params_b, stride=1))
    assert y_b.shape == (2, 128, 8, 8), y_b.shape
    assert bool(jnp.all(jnp.isfinite(y_b)))
    ref_b = reference_forward(y_a, params_b, 1)
    assert bool(jnp.allclose(y_b, ref_b, rtol=5e-2, atol=5e-2)), \
        float(jnp.max(jnp.abs(y_b - ref_b)))

    print("KERNEL_OK")
</pallas_src>

<mosaic_0001>
module attributes {stable_mosaic.version = 11 : i64} {
  func.func @kernel(%arg0: i32, %arg1: memref<1x4x64x32xbf16, #tpu.memory_space<vmem>>, %arg2: memref<32x64xbf16, #tpu.memory_space<vmem>>, %arg3: memref<1x64xf32, #tpu.memory_space<vmem>>, %arg4: memref<9x64x64xbf16, #tpu.memory_space<vmem>>, %arg5: memref<1x64xf32, #tpu.memory_space<vmem>>, %arg6: memref<64x128xbf16, #tpu.memory_space<vmem>>, %arg7: memref<1x128xf32, #tpu.memory_space<vmem>>, %arg8: memref<32x128xbf16, #tpu.memory_space<vmem>>, %arg9: memref<1x128xf32, #tpu.memory_space<vmem>>, %arg10: memref<1x64x128xf32, #tpu.memory_space<vmem>>, %arg11: memref<4x10x10x64xf32, #tpu.memory_space<vmem>>) attributes {dimension_semantics = [#tpu.dimension_semantics<parallel>], iteration_bounds = array<i64: 2>, scalar_prefetch = 0 : i64, scratch_operands = 1 : i64, tpu.core_type = #tpu.core_type<tc>, window_params = [{transform_indices = @transform_0, window_bounds = array<i64: 1, 4, 64, 32>}, {pipeline_mode = #tpu.pipeline_mode<synchronous>, transform_indices = @transform_1, window_bounds = array<i64: 32, 64>}, {pipeline_mode = #tpu.pipeline_mode<synchronous>, transform_indices = @transform_2, window_bounds = array<i64: 1, 64>}, {pipeline_mode = #tpu.pipeline_mode<synchronous>, transform_indices = @transform_3, window_bounds = array<i64: 9, 64, 64>}, {pipeline_mode = #tpu.pipeline_mode<synchronous>, transform_indices = @transform_4, window_bounds = array<i64: 1, 64>}, {pipeline_mode = #tpu.pipeline_mode<synchronous>, transform_indices = @transform_5, window_bounds = array<i64: 64, 128>}, {pipeline_mode = #tpu.pipeline_mode<synchronous>, transform_indices = @transform_6, window_bounds = array<i64: 1, 128>}, {pipeline_mode = #tpu.pipeline_mode<synchronous>, transform_indices = @transform_7, window_bounds = array<i64: 32, 128>}, {pipeline_mode = #tpu.pipeline_mode<synchronous>, transform_indices = @transform_8, window_bounds = array<i64: 1, 128>}, {transform_indices = @transform_9, window_bounds = array<i64: 1, 64, 128>}]} {
    %c0 = arith.constant 0 : index
    %c0_0 = arith.constant 0 : index
    %c0_1 = arith.constant 0 : index
    %c0_2 = arith.constant 0 : index
    %0 = vector.load %arg1[%c0, %c0_0, %c0_1, %c0_2] : memref<1x4x64x32xbf16, #tpu.memory_space<vmem>>, vector<1x4x64x32xbf16>
    %1 = vector.shape_cast %0 : vector<1x4x64x32xbf16> to vector<4x64x32xbf16>
    %2 = vector.shape_cast %1 : vector<4x64x32xbf16> to vector<256x32xbf16>
    %c0_3 = arith.constant 0 : index
    %c0_4 = arith.constant 0 : index
    %3 = vector.load %arg2[%c0_3, %c0_4] : memref<32x64xbf16, #tpu.memory_space<vmem>>, vector<32x64xbf16>
    %cst = arith.constant dense<0.000000e+00> : vector<256x64xf32>
    %4 = tpu.matmul %2, %3, %cst {dimension_numbers = #tpu.dot_dimension_numbers<[1], [0], [0], [1], [0, 0, 1, 1], [], []>} : vector<256x32xbf16>, vector<32x64xbf16>, vector<256x64xf32> -> vector<256x64xf32>
    %c0_5 = arith.constant 0 : index
    %c0_6 = arith.constant 0 : index
    %5 = vector.load %arg3[%c0_5, %c0_6] : memref<1x64xf32, #tpu.memory_space<vmem>>, vector<1x64xf32>
    %6 = vector.broadcast %5 : vector<1x64xf32> to vector<256x64xf32>
    %7 = arith.addf %4, %6 : vector<256x64xf32>
    %cst_7 = arith.constant 0.000000e+00 : f32
    %8 = vector.broadcast %cst_7 : f32 to vector<256x64xf32>
    %9 = arith.maximumf %7, %8 : vector<256x64xf32>
    %10 = vector.shape_cast %9 : vector<256x64xf32> to vector<4x8x8x64xf32>
    %cst_8 = arith.constant 0.000000e+00 : f32
    %11 = vector.broadcast %cst_8 : f32 to vector<4x10x10x64xf32>
    %c0_9 = arith.constant 0 : index
    %c0_10 = arith.constant 0 : index
    %c0_11 = arith.constant 0 : index
    %c0_12 = arith.constant 0 : index
    %12 = vector.load %arg11[%c0_9, %c0_10, %c0_11, %c0_12] : memref<4x10x10x64xf32, #tpu.memory_space<vmem>>, vector<4x10x10x64xf32>
    tpu.vector_store %arg11[%c0_9, %c0_10, %c0_11, %c0_12], %11 {strides = array<i32>} : memref<4x10x10x64xf32, #tpu.memory_space<vmem>>, vector<4x10x10x64xf32>,
    %13 = vector.extract_strided_slice %10 {offsets = [0, 0, 0, 0], sizes = [1, 8, 8, 64], strides = [1, 1, 1, 1]} : vector<4x8x8x64xf32> to vector<1x8x8x64xf32>
    %14 = vector.shape_cast %13 : vector<1x8x8x64xf32> to vector<8x8x64xf32>
    %c0_13 = arith.constant 0 : index
    %c1 = arith.constant 1 : index
    %c1_14 = arith.constant 1 : index
    %c0_15 = arith.constant 0 : index
    %15 = vector.load %arg11[%c0_13, %c1, %c1_14, %c0_15] : memref<4x10x10x64xf32, #tpu.memory_space<vmem>>, vector<1x8x8x64xf32>
    %16 = vector.shape_cast %15 : vector<1x8x8x64xf32> to vector<8x8x64xf32>
    %17 = vector.shape_cast %14 : vector<8x8x64xf32> to vector<1x8x8x64xf32>
    tpu.vector_store %arg11[%c0_13, %c1, %c1_14, %c0_15], %17 {strides = array<i32>} : memref<4x10x10x64xf32, #tpu.memory_space<vmem>>, vector<1x8x8x64xf32>,
    %18 = vector.extract_strided_slice %10 {offsets = [1, 0, 0, 0], sizes = [1, 8, 8, 64], strides = [1, 1, 1, 1]} : vector<4x8x8x64xf32> to vector<1x8x8x64xf32>
    %19 = vector.shape_cast %18 : vector<1x8x8x64xf32> to vector<8x8x64xf32>
    %c1_16 = arith.constant 1 : index
    %c1_17 = arith.constant 1 : index
    %c1_18 = arith.constant 1 : index
    %c0_19 = arith.constant 0 : index
    %20 = vector.load %arg11[%c1_16, %c1_17, %c1_18, %c0_19] : memref<4x10x10x64xf32, #tpu.memory_space<vmem>>, vector<1x8x8x64xf32>
    %21 = vector.shape_cast %20 : vector<1x8x8x64xf32> to vector<8x8x64xf32>
    %22 = vector.shape_cast %19 : vector<8x8x64xf32> to vector<1x8x8x64xf32>
    tpu.vector_store %arg11[%c1_16, %c1_17, %c1_18, %c0_19], %22 {strides = array<i32>} : memref<4x10x10x64xf32, #tpu.memory_space<vmem>>, vector<1x8x8x64xf32>,
    %23 = vector.extract_strided_slice %10 {offsets = [2, 0, 0, 0], sizes = [1, 8, 8, 64], strides = [1, 1, 1, 1]} : vector<4x8x8x64xf32> to vector<1x8x8x64xf32>
    %24 = vector.shape_cast %23 : vector<1x8x8x64xf32> to vector<8x8x64xf32>
    %c2 = arith.constant 2 : index
    %c1_20 = arith.constant 1 : index
    %c1_21 = arith.constant 1 : index
    %c0_22 = arith.constant 0 : index
    %25 = vector.load %arg11[%c2, %c1_20, %c1_21, %c0_22] : memref<4x10x10x64xf32, #tpu.memory_space<vmem>>, vector<1x8x8x64xf32>
    %26 = vector.shape_cast %25 : vector<1x8x8x64xf32> to vector<8x8x64xf32>
    %27 = vector.shape_cast %24 : vector<8x8x64xf32> to vector<1x8x8x64xf32>
    tpu.vector_store %arg11[%c2, %c1_20, %c1_21, %c0_22], %27 {strides = array<i32>} : memref<4x10x10x64xf32, #tpu.memory_space<vmem>>, vector<1x8x8x64xf32>,
    %28 = vector.extract_strided_slice %10 {offsets = [3, 0, 0, 0], sizes = [1, 8, 8, 64], strides = [1, 1, 1, 1]} : vector<4x8x8x64xf32> to vector<1x8x8x64xf32>
    %29 = vector.shape_cast %28 : vector<1x8x8x64xf32> to vector<8x8x64xf32>
    %c3 = arith.constant 3 : index
    %c1_23 = arith.constant 1 : index
    %c1_24 = arith.constant 1 : index
    %c0_25 = arith.constant 0 : index
    %30 = vector.load %arg11[%c3, %c1_23, %c1_24, %c0_25] : memref<4x10x10x64xf32, #tpu.memory_space<vmem>>, vector<1x8x8x64xf32>
    %31 = vector.shape_cast %30 : vector<1x8x8x64xf32> to vector<8x8x64xf32>
    %32 = vector.shape_cast %29 : vector<8x8x64xf32> to vector<1x8x8x64xf32>
    tpu.vector_store %arg11[%c3, %c1_23, %c1_24, %c0_25], %32 {strides = array<i32>} : memref<4x10x10x64xf32, #tpu.memory_space<vmem>>, vector<1x8x8x64xf32>,
    %cst_26 = arith.constant 0.000000e+00 : f32
    %33 = vector.broadcast %cst_26 : f32 to vector<64x64xf32>
    %c3_27 = arith.constant 3 : index
    %c0_28 = arith.constant 0 : index
    %c0_29 = arith.constant 0 : index
    %c0_30 = arith.constant 0 : index
    %34 = vector.load %arg11[%c3_27, %c0_28, %c0_29, %c0_30] : memref<4x10x10x64xf32, #tpu.memory_space<vmem>>, vector<1x8x8x64xf32>
    %35 = vector.shape_cast %34 : vector<1x8x8x64xf32> to vector<8x8x64xf32>
    %36 = vector.shape_cast %35 : vector<8x8x64xf32> to vector<64x64xf32>
    %37 = arith.truncf %36 : vector<64x64xf32> to vector<64x64xbf16>
    %c0_31 = arith.constant 0 : index
    %c0_32 = arith.constant 0 : index
    %c0_33 = arith.constant 0 : index
    %38 = vector.load %arg4[%c0_31, %c0_32, %c0_33] : memref<9x64x64xbf16, #tpu.memory_space<vmem>>, vector<1x64x64xbf16>
    %39 = vector.shape_cast %38 : vector<1x64x64xbf16> to vector<64x64xbf16>
    %cst_34 = arith.constant dense<0.000000e+00> : vector<64x64xf32>
    %40 = tpu.matmul %37, %39, %cst_34 {dimension_numbers = #tpu.dot_dimension_numbers<[1], [0], [0], [1], [0, 0, 1, 1], [], []>} : vector<64x64xbf16>, vector<64x64xbf16>, vector<64x64xf32> -> vector<64x64xf32>
    %41 = arith.addf %33, %40 : vector<64x64xf32>
    %c2_35 = arith.constant 2 : index
    %c0_36 = arith.constant 0 : index
    %c1_37 = arith.constant 1 : index
    %c0_38 = arith.constant 0 : index
    %42 = vector.load %arg11[%c2_35, %c0_36, %c1_37, %c0_38] : memref<4x10x10x64xf32, #tpu.memory_space<vmem>>, vector<1x8x8x64xf32>
    %43 = vector.shape_cast %42 : vector<1x8x8x64xf32> to vector<8x8x64xf32>
    %44 = vector.shape_cast %43 : vector<8x8x64xf32> to vector<64x64xf32>
    %45 = arith.truncf %44 : vector<64x64xf32> to vector<64x64xbf16>
    %c1_39 = arith.constant 1 : index
    %c0_40 = arith.constant 0 : index
    %c0_41 = arith.constant 0 : index
    %46 = vector.load %arg4[%c1_39, %c0_40, %c0_41] : memref<9x64x64xbf16, #tpu.memory_space<vmem>>, vector<1x64x64xbf16>
    %47 = vector.shape_cast %46 : vector<1x64x64xbf16> to vector<64x64xbf16>
    %cst_42 = arith.constant dense<0.000000e+00> : vector<64x64xf32>
    %48 = tpu.matmul %45, %47, %cst_42 {dimension_numbers = #tpu.dot_dimension_numbers<[1], [0], [0], [1], [0, 0, 1, 1], [], []>} : vector<64x64xbf16>, vector<64x64xbf16>, vector<64x64xf32> -> vector<64x64xf32>
    %49 = arith.addf %41, %48 : vector<64x64xf32>
    %c3_43 = arith.constant 3 : index
    %c0_44 = arith.constant 0 : index
    %c1_45 = arith.constant 1 : index
    %c0_46 = arith.constant 0 : index
    %50 = vector.load %arg11[%c3_43, %c0_44, %c1_45, %c0_46] : memref<4x10x10x64xf32, #tpu.memory_space<vmem>>, vector<1x8x8x64xf32>
    %51 = vector.shape_cast %50 : vector<1x8x8x64xf32> to vector<8x8x64xf32>
    %52 = vector.shape_cast %51 : vector<8x8x64xf32> to vector<64x64xf32>
    %53 = arith.truncf %52 : vector<64x64xf32> to vector<64x64xbf16>
    %c2_47 = arith.constant 2 : index
    %c0_48 = arith.constant 0 : index
    %c0_49 = arith.constant 0 : index
    %54 = vector.load %arg4[%c2_47, %c0_48, %c0_49] : memref<9x64x64xbf16, #tpu.memory_space<vmem>>, vector<1x64x64xbf16>
    %55 = vector.shape_cast %54 : vector<1x64x64xbf16> to vector<64x64xbf16>
    %cst_50 = arith.constant dense<0.000000e+00> : vector<64x64xf32>
    %56 = tpu.matmul %53, %55, %cst_50 {dimension_numbers = #tpu.dot_dimension_numbers<[1], [0], [0], [1], [0, 0, 1, 1], [], []>} : vector<64x64xbf16>, vector<64x64xbf16>, vector<64x64xf32> -> vector<64x64xf32>
    %57 = arith.addf %49, %56 : vector<64x64xf32>
    %c1_51 = arith.constant 1 : index
    %c1_52 = arith.constant 1 : index
    %c0_53 = arith.constant 0 : index
    %c0_54 = arith.constant 0 : index
    %58 = vector.load %arg11[%c1_51, %c1_52, %c0_53, %c0_54] : memref<4x10x10x64xf32, #tpu.memory_space<vmem>>, vector<1x8x8x64xf32>
    %59 = vector.shape_cast %58 : vector<1x8x8x64xf32> to vector<8x8x64xf32>
    %60 = vector.shape_cast %59 : vector<8x8x64xf32> to vector<64x64xf32>
    %61 = arith.truncf %60 : vector<64x64xf32> to vector<64x64xbf16>
    %c3_55 = arith.constant 3 : index
    %c0_56 = arith.constant 0 : index
    %c0_57 = arith.constant 0 : index
    %62 = vector.load %arg4[%c3_55, %c0_56, %c0_57] : memref<9x64x64xbf16, #tpu.memory_space<vmem>>, vector<1x64x64xbf16>
    %63 = vector.shape_cast %62 : vector<1x64x64xbf16> to vector<64x64xbf16>
    %cst_58 = arith.constant dense<0.000000e+00> : vector<64x64xf32>
    %64 = tpu.matmul %61, %63, %cst_58 {dimension_numbers = #tpu.dot_dimension_numbers<[1], [0], [0], [1], [0, 0, 1, 1], [], []>} : vector<64x64xbf16>, vector<64x64xbf16>, vector<64x64xf32> -> vector<64x64xf32>
    %65 = arith.addf %57, %64 : vector<64x64xf32>
    %c0_59 = arith.constant 0 : index
    %c1_60 = arith.constant 1 : index
    %c1_61 = arith.constant 1 : index
    %c0_62 = arith.constant 0 : index
    %66 = vector.load %arg11[%c0_59, %c1_60, %c1_61, %c0_62] : memref<4x10x10x64xf32, #tpu.memory_space<vmem>>, vector<1x8x8x64xf32>
    %67 = vector.shape_cast %66 : vector<1x8x8x64xf32> to vector<8x8x64xf32>
    %68 = vector.shape_cast %67 : vector<8x8x64xf32> to vector<64x64xf32>
    %69 = arith.truncf %68 : vector<64x64xf32> to vector<64x64xbf16>
    %c4 = arith.constant 4 : index
    %c0_63 = arith.constant 0 : index
    %c0_64 = arith.constant 0 : index
    %70 = vector.load %arg4[%c4, %c0_63, %c0_64] : memref<9x64x64xbf16, #tpu.memory_space<vmem>>, vector<1x64x64xbf16>
    %71 = vector.shape_cast %70 : vector<1x64x64xbf16> to vector<64x64xbf16>
    %cst_65 = arith.constant dense<0.000000e+00> : vector<64x64xf32>
    %72 = tpu.matmul %69, %71, %cst_65 {dimension_numbers = #tpu.dot_dimension_numbers<[1], [0], [0], [1], [0, 0, 1, 1], [], []>} : vector<64x64xbf16>, vector<64x64xbf16>, vector<64x64xf32> -> vector<64x64xf32>
    %73 = arith.addf %65, %72 : vector<64x64xf32>
    %c1_66 = arith.constant 1 : index
    %c1_67 = arith.constant 1 : index
    %c1_68 = arith.constant 1 : index
    %c0_69 = arith.constant 0 : index
    %74 = vector.load %arg11[%c1_66, %c1_67, %c1_68, %c0_69] : memref<4x10x10x64xf32, #tpu.memory_space<vmem>>, vector<1x8x8x64xf32>
    %75 = vector.shape_cast %74 : vector<1x8x8x64xf32> to vector<8x8x64xf32>
    %76 = vector.shape_cast %75 : vector<8x8x64xf32> to vector<64x64xf32>
    %77 = arith.truncf %76 : vector<64x64xf32> to vector<64x64xbf16>
    %c5 = arith.constant 5 : index
    %c0_70 = arith.constant 0 : index
    %c0_71 = arith.constant 0 : index
    %78 = vector.load %arg4[%c5, %c0_70, %c0_71] : memref<9x64x64xbf16, #tpu.memory_space<vmem>>, vector<1x64x64xbf16>
    %79 = vector.shape_cast %78 : vector<1x64x64xbf16> to vector<64x64xbf16>
    %cst_72 = arith.constant dense<0.000000e+00> : vector<64x64xf32>
    %80 = tpu.matmul %77, %79, %cst_72 {dimension_numbers = #tpu.dot_dimension_numbers<[1], [0], [0], [1], [0, 0, 1, 1], [], []>} : vector<64x64xbf16>, vector<64x64xbf16>, vector<64x64xf32> -> vector<64x64xf32>
    %81 = arith.addf %73, %80 : vector<64x64xf32>
    %c3_73 = arith.constant 3 : index
    %c1_74 = arith.constant 1 : index
    %c0_75 = arith.constant 0 : index
    %c0_76 = arith.constant 0 : index
    %82 = vector.load %arg11[%c3_73, %c1_74, %c0_75, %c0_76] : memref<4x10x10x64xf32, #tpu.memory_space<vmem>>, vector<1x8x8x64xf32>
    %83 = vector.shape_cast %82 : vector<1x8x8x64xf32> to vector<8x8x64xf32>
    %84 = vector.shape_cast %83 : vector<8x8x64xf32> to vector<64x64xf32>
    %85 = arith.truncf %84 : vector<64x64xf32> to vector<64x64xbf16>
    %c6 = arith.constant 6 : index
    %c0_77 = arith.constant 0 : index
    %c0_78 = arith.constant 0 : index
    %86 = vector.load %arg4[%c6, %c0_77, %c0_78] : memref<9x64x64xbf16, #tpu.memory_space<vmem>>, vector<1x64x64xbf16>
    %87 = vector.shape_cast %86 : vector<1x64x64xbf16> to vector<64x64xbf16>
    %cst_79 = arith.constant dense<0.000000e+00> : vector<64x64xf32>
    %88 = tpu.matmul %85, %87, %cst_79 {dimension_numbers = #tpu.dot_dimension_numbers<[1], [0], [0], [1], [0, 0, 1, 1], [], []>} : vector<64x64xbf16>, vector<64x64xbf16>, vector<64x64xf32> -> vector<64x64xf32>
    %89 = arith.addf %81, %88 : vector<64x64xf32>
    %c2_80 = arith.constant 2 : index
    %c1_81 = arith.constant 1 : index
    %c1_82 = arith.constant 1 : index
    %c0_83 = arith.constant 0 : index
    %90 = vector.load %arg11[%c2_80, %c1_81, %c1_82, %c0_83] : memref<4x10x10x64xf32, #tpu.memory_space<vmem>>, vector<1x8x8x64xf32>
    %91 = vector.shape_cast %90 : vector<1x8x8x64xf32> to vector<8x8x64xf32>
    %92 = vector.shape_cast %91 : vector<8x8x64xf32> to vector<64x64xf32>
    %93 = arith.truncf %92 : vector<64x64xf32> to vector<64x64xbf16>
    %c7 = arith.constant 7 : index
    %c0_84 = arith.constant 0 : index
    %c0_85 = arith.constant 0 : index
    %94 = vector.load %arg4[%c7, %c0_84, %c0_85] : memref<9x64x64xbf16, #tpu.memory_space<vmem>>, vector<1x64x64xbf16>
    %95 = vector.shape_cast %94 : vector<1x64x64xbf16> to vector<64x64xbf16>
    %cst_86 = arith.constant dense<0.000000e+00> : vector<64x64xf32>
    %96 = tpu.matmul %93, %95, %cst_86 {dimension_numbers = #tpu.dot_dimension_numbers<[1], [0], [0], [1], [0, 0, 1, 1], [], []>} : vector<64x64xbf16>, vector<64x64xbf16>, vector<64x64xf32> -> vector<64x64xf32>
    %97 = arith.addf %89, %96 : vector<64x64xf32>
    %c3_87 = arith.constant 3 : index
    %c1_88 = arith.constant 1 : index
    %c1_89 = arith.constant 1 : index
    %c0_90 = arith.constant 0 : index
    %98 = vector.load %arg11[%c3_87, %c1_88, %c1_89, %c0_90] : memref<4x10x10x64xf32, #tpu.memory_space<vmem>>, vector<1x8x8x64xf32>
    %99 = vector.shape_cast %98 : vector<1x8x8x64xf32> to vector<8x8x64xf32>
    %100 = vector.shape_cast %99 : vector<8x8x64xf32> to vector<64x64xf32>
    %101 = arith.truncf %100 : vector<64x64xf32> to vector<64x64xbf16>
    %c8 = arith.constant 8 : index
    %c0_91 = arith.constant 0 : index
    %c0_92 = arith.constant 0 : index
    %102 = vector.load %arg4[%c8, %c0_91, %c0_92] : memref<9x64x64xbf16, #tpu.memory_space<vmem>>, vector<1x64x64xbf16>
    %103 = vector.shape_cast %102 : vector<1x64x64xbf16> to vector<64x64xbf16>
    %cst_93 = arith.constant dense<0.000000e+00> : vector<64x64xf32>
    %104 = tpu.matmul %101, %103, %cst_93 {dimension_numbers = #tpu.dot_dimension_numbers<[1], [0], [0], [1], [0, 0, 1, 1], [], []>} : vector<64x64xbf16>, vector<64x64xbf16>, vector<64x64xf32> -> vector<64x64xf32>
    %105 = arith.addf %97, %104 : vector<64x64xf32>
    %c0_94 = arith.constant 0 : index
    %c0_95 = arith.constant 0 : index
    %106 = vector.load %arg5[%c0_94, %c0_95] : memref<1x64xf32, #tpu.memory_space<vmem>>, vector<1x64xf32>
    %107 = vector.broadcast %106 : vector<1x64xf32> to vector<64x64xf32>
    %108 = arith.addf %105, %107 : vector<64x64xf32>
    %cst_96 = arith.constant 0.000000e+00 : f32
    %109 = vector.broadcast %cst_96 : f32 to vector<64x64xf32>
    %110 = arith.maximumf %108, %109 : vector<64x64xf32>
    %111 = arith.truncf %110 : vector<64x64xf32> to vector<64x64xbf16>
    %c0_97 = arith.constant 0 : index
    %c0_98 = arith.constant 0 : index
    %112 = vector.load %arg6[%c0_97, %c0_98] : memref<64x128xbf16, #tpu.memory_space<vmem>>, vector<64x128xbf16>
    %cst_99 = arith.constant dense<0.000000e+00> : vector<64x128xf32>
    %113 = tpu.matmul %111, %112, %cst_99 {dimension_numbers = #tpu.dot_dimension_numbers<[1], [0], [0], [1], [0, 0, 1, 1], [], []>} : vector<64x64xbf16>, vector<64x128xbf16>, vector<64x128xf32> -> vector<64x128xf32>
    %c0_100 = arith.constant 0 : index
    %c0_101 = arith.constant 0 : index
    %114 = vector.load %arg7[%c0_100, %c0_101] : memref<1x128xf32, #tpu.memory_space<vmem>>, vector<1x128xf32>
    %115 = vector.broadcast %114 : vector<1x128xf32> to vector<64x128xf32>
    %116 = arith.addf %113, %115 : vector<64x128xf32>
    %c0_102 = arith.constant 0 : index
    %c0_103 = arith.constant 0 : index
    %c0_104 = arith.constant 0 : index
    %c0_105 = arith.constant 0 : index
    %117 = vector.load %arg1[%c0_102, %c0_103, %c0_104, %c0_105] : memref<1x4x64x32xbf16, #tpu.memory_space<vmem>>, vector<1x1x64x32xbf16>
    %118 = vector.shape_cast %117 : vector<1x1x64x32xbf16> to vector<64x32xbf16>
    %c0_106 = arith.constant 0 : index
    %c0_107 = arith.constant 0 : index
    %119 = vector.load %arg8[%c0_106, %c0_107] : memref<32x128xbf16, #tpu.memory_space<vmem>>, vector<32x128xbf16>
    %cst_108 = arith.constant dense<0.000000e+00> : vector<64x128xf32>
    %120 = tpu.matmul %118, %119, %cst_108 {dimension_numbers = #tpu.dot_dimension_numbers<[1], [0], [0], [1], [0, 0, 1, 1], [], []>} : vector<64x32xbf16>, vector<32x128xbf16>, vector<64x128xf32> -> vector<64x128xf32>
    %c0_109 = arith.constant 0 : index
    %c0_110 = arith.constant 0 : index
    %121 = vector.load %arg9[%c0_109, %c0_110] : memref<1x128xf32, #tpu.memory_space<vmem>>, vector<1x128xf32>
    %122 = vector.broadcast %121 : vector<1x128xf32> to vector<64x128xf32>
    %123 = arith.addf %120, %122 : vector<64x128xf32>
    %124 = arith.addf %116, %123 : vector<64x128xf32>
    %cst_111 = arith.constant 0.000000e+00 : f32
    %125 = vector.broadcast %cst_111 : f32 to vector<64x128xf32>
    %126 = arith.maximumf %124, %125 : vector<64x128xf32>
    %c0_112 = arith.constant 0 : index
    %c0_113 = arith.constant 0 : index
    %c0_114 = arith.constant 0 : index
    %127 = vector.load %arg10[%c0_112, %c0_113, %c0_114] : memref<1x64x128xf32, #tpu.memory_space<vmem>>, vector<1x64x128xf32>
    %128 = vector.shape_cast %127 : vector<1x64x128xf32> to vector<64x128xf32>
    %129 = vector.shape_cast %126 : vector<64x128xf32> to vector<1x64x128xf32>
    tpu.vector_store %arg10[%c0_112, %c0_113, %c0_114], %129 {strides = array<i32>} : memref<1x64x128xf32, #tpu.memory_space<vmem>>, vector<1x64x128xf32>,
    return
  }
  func.func @transform_0(%arg0: i32) -> (i32, i32, i32, i32) {
    %c0_i32 = arith.constant 0 : i32
    %c0_i32_0 = arith.constant 0 : i32
    %c0_i32_1 = arith.constant 0 : i32
    %c0_i32_2 = arith.constant 0 : i32
    return %arg0, %c0_i32, %c0_i32_0, %c0_i32_1 : i32, i32, i32, i32
  }
  func.func @transform_1(%arg0: i32) -> (i32, i32) {
    %c0_i32 = arith.constant 0 : i32
    %c0_i32_0 = arith.constant 0 : i32
    %c0_i32_1 = arith.constant 0 : i32
    return %c0_i32, %c0_i32_0 : i32, i32
  }
  func.func @transform_2(%arg0: i32) -> (i32, i32) {
    %c0_i32 = arith.constant 0 : i32
    %c0_i32_0 = arith.constant 0 : i32
    %c0_i32_1 = arith.constant 0 : i32
    return %c0_i32, %c0_i32_0 : i32, i32
  }
  func.func @transform_3(%arg0: i32) -> (i32, i32, i32) {
    %c0_i32 = arith.constant 0 : i32
    %c0_i32_0 = arith.constant 0 : i32
    %c0_i32_1 = arith.constant 0 : i32
    %c0_i32_2 = arith.constant 0 : i32
    return %c0_i32, %c0_i32_0, %c0_i32_1 : i32, i32, i32
  }
  func.func @transform_4(%arg0: i32) -> (i32, i32) {
    %c0_i32 = arith.constant 0 : i32
    %c0_i32_0 = arith.constant 0 : i32
    %c0_i32_1 = arith.constant 0 : i32
    return %c0_i32, %c0_i32_0 : i32, i32
  }
  func.func @transform_5(%arg0: i32) -> (i32, i32) {
    %c0_i32 = arith.constant 0 : i32
    %c0_i32_0 = arith.constant 0 : i32
    %c0_i32_1 = arith.constant 0 : i32
    return %c0_i32, %c0_i32_0 : i32, i32
  }
  func.func @transform_6(%arg0: i32) -> (i32, i32) {
    %c0_i32 = arith.constant 0 : i32
    %c0_i32_0 = arith.constant 0 : i32
    %c0_i32_1 = arith.constant 0 : i32
    return %c0_i32, %c0_i32_0 : i32, i32
  }
  func.func @transform_7(%arg0: i32) -> (i32, i32) {
    %c0_i32 = arith.constant 0 : i32
    %c0_i32_0 = arith.constant 0 : i32
    %c0_i32_1 = arith.constant 0 : i32
    return %c0_i32, %c0_i32_0 : i32, i32
  }
  func.func @transform_8(%arg0: i32) -> (i32, i32) {
    %c0_i32 = arith.constant 0 : i32
    %c0_i32_0 = arith.constant 0 : i32
    %c0_i32_1 = arith.constant 0 : i32
    return %c0_i32, %c0_i32_0 : i32, i32
  }
  func.func @transform_9(%arg0: i32) -> (i32, i32, i32) {
    %c0_i32 = arith.constant 0 : i32
    %c0_i32_0 = arith.constant 0 : i32
    %c0_i32_1 = arith.constant 0 : i32
    return %arg0, %c0_i32, %c0_i32_0 : i32, i32, i32
  }
}

</mosaic_0001>

<bundles_post_ra>
// kernel: residual_block_forward.1
= control target key start
LH: loop header
LB: loop body
LE: loop exit
PB: predicated region body
PF: predicated region fallthrough
CT: control target
= control target key end

     0   :  { %14 = vsyncpa [#allocation4], 0  ;;  %s3828_s0 = inlined_call_operand.vmem [shape: bf16[2,4,64,32], index: 0, kind: input, shape index: {}]   ;;  %s3829_s1 = inlined_call_operand.vmem [shape: bf16[32,64], index: 1, kind: input, shape index: {}]   ;;  %s3830_s2 = inlined_call_operand.vmem [shape: f32[1,64], index: 2, kind: input, shape index: {}]   ;;  %s3831_s3 = inlined_call_operand.vmem [shape: bf16[9,64,64], index: 3, kind: input, shape index: {}]   ;;  %s3832_s4 = inlined_call_operand.vmem [shape: f32[1,64], index: 4, kind: input, shape index: {}]   ;;  %s3833_s5 = inlined_call_operand.vmem [shape: bf16[64,128], index: 5, kind: input, shape index: {}]   ;;  %s3834_s6 = inlined_call_operand.vmem [shape: f32[1,128], index: 6, kind: input, shape index: {}]   ;;  %s3835_s7 = inlined_call_operand.vmem [shape: bf16[32,128], index: 7, kind: input, shape index: {}]   ;;  %s3836_s8 = inlined_call_operand.vmem [shape: f32[1,128], index: 8, kind: input, shape index: {}]   ;;  %s3837_s9 = inlined_call_operand.hbm [shape: f32[2,64,128], index: 9, kind: output, shape index: {}]  }
   0x1   :  { %16 = vsyncpa [#allocation4 + $0x1], 0  ;;  %s3183_s30 = smov 0   ;;  %s3185_s10 = smov 0  }
   0x2   :  { %s3187_s11 = smov 0   ;;  %s3189_s12 = smov 0  }
   0x3 LB: > { %s3204_s13 = sadd.s32 4294967295, %s3127_s12   ;;  %s2353_s14 = sadd.s32 4294967294, %s3127_s12   ;;  %s3127_s12 = sphi %s3189_s12, %s3843_s12   ;;  %s3123_s11 = sphi %s3187_s11, %s3842_s11   ;;  %s3119_s10 = sphi %s3185_s10, %s3841_s10   ;;  %s3115_s30 = sphi %s3183_s30, %s3840_s30  }
   0x4   : > { %s3208_s15 = sadd.s32 1, %s3127_s12   ;;  %s223_s16 = sadd.s32 1, %s3123_s11 }
   0x5   : > { %s220_s17 = ssub.s32 %s3127_s12, %s3208_s15  ;;  %p233_p0 = scmp.ne.s32.totalorder %s3123_s11, %s3119_s10 }
   0x6   : > { %p221_p1 = scmp.eq.s32.totalorder %s220_s17, 0  ;;  %p234_p2 = scmp.eq.s32.totalorder %s3204_s13, 1 }
   0x7   : > { %p239_p3 = scmp.ne.s32.totalorder %s3119_s10, %s3115_s30  ;;  %p240_p4 = scmp.eq.s32.totalorder %s2353_s14, 1 }
   0x8   : > { %s3219_s18 = scalar_select %p221_p1, %s3123_s11, %s223_s16  }
   0x9   : > { %p3221_p5 = por %p234_p2, %p233_p0  ;;  %p3225_p6 = por %p240_p4, %p239_p3 }
   0xa   : > { %p2356_p7 = scmp.ge.s32.totalorder %s3127_s12, 1  ;;  %p290_p8 = scmp.lt.s32.totalorder %s3127_s12, 3 }
   0xc   : > { %p291_p9 = pnand %p2356_p7, %p290_p8 }
   0xd   : > { %v3001_v0 = vld [vmem:[%s3829_s1] sm:$0xff] (!%p291_p9)   ;;  %p326_p10 = scmp.lt.s32.totalorder (!%p291_p9), %s3204_s13, 1  ;;  %v3002_v1 = vld [vmem:[%s3829_s1 + $0x8] sm:$0xff] (!%p291_p9)   ;;  %vm467_vm0 = vcmask (!%p291_p9), 261120   ;;  %vm709_vm1 = vcmask (!%p291_p9), 523264   ;;  %vm711_vm2 = vcmask (!%p291_p9), 517120  }
   0xe   : > { %294 = sbr.rel (%p291_p9) target bundleno = 883 (0x373), region = 56  ;;  %2663 = vmatprep.subr.bf16.mxu0 (!%p291_p9), %v3001_v0  ;;  %v3129_v18 = vmov (!%p291_p9), 0.0   ;;  %v3019_v19 = vld [vmem:[%s3831_s3 + $0x20] sm:$0xff] (!%p291_p9)   ;;  %v3020_v20 = vld [vmem:[%s3831_s3 + $0x28] sm:$0xff] (!%p291_p9)   ;;  %v3021_v21 = vld [vmem:[%s3831_s3 + $0x30] sm:$0xff] (!%p291_p9)   ;;  %s323_s22 = sand.u32 (!%p291_p9), 1, %s3119_s10  }
   0xf   : > { %2664 = vmatpush3.bf16.msra.mxu0 (!%p291_p9), %v3001_v0  ;;  %717 = vst.msk [vmem:[#allocation2 + $0x30] sm:$0xff] (!%p291_p9), %vm709_vm1, %v3129_v18  ;;  %713 = vst.msk [vmem:[#allocation2 + $0x10] sm:$0xff] (!%p291_p9), %vm709_vm1, %v3129_v18  ;;  %v3022_v22 = vld [vmem:[%s3831_s3 + $0x38] sm:$0xff] (!%p291_p9)   ;;  %v3023_v23 = vld [vmem:[%s3831_s3 + $0x40] sm:$0xff] (!%p291_p9)   ;;  %s2357_s23 = sshll.u32 (!%p291_p9), %s323_s22, 6  ;;  %s2558_s24 = sshll.u32 (!%p291_p9), %s3204_s13, 10 }
  0x10   : > { %2665 = vmatprep.subr.bf16.mxu0 (!%p291_p9), %v3002_v1  ;;  %718 = vst.msk [vmem:[#allocation2 + $0x38] sm:$0x3] (!%p291_p9), %vm711_vm2, %v3129_v18  ;;  %714 = vst.msk [vmem:[#allocation2 + $0x18] sm:$0x3] (!%p291_p9), %vm711_vm2, %v3129_v18  ;;  %v3430_v24 = vld [vmem:[%s3831_s3] sm:$0xff] (!%p291_p9)   ;;  %2731 = vmatprep.subr.bf16.mxu1 (!%p291_p9), %v3023_v23  ;;  %v3025_v25 = vld [vmem:[%s3831_s3 + $0x48] sm:$0xff] (!%p291_p9)   ;;  %s3781_s28 = scalar_lea.hbm (!%p291_p9), %s3837_s9, %s2558_s24 }
  0x11   : > { %715 = vst.msk [vmem:[#allocation2 + $0x20] sm:$0xff] (!%p291_p9), %vm709_vm1, %v3129_v18  ;;  %719 = vst.msk [vmem:[#allocation2 + $0x40] sm:$0xff] (!%p291_p9), %vm709_vm1, %v3129_v18  ;;  %2732 = vmatpush3.bf16.msra.mxu1 (!%p291_p9), %v3023_v23  ;;  %v3027_v26 = vld [vmem:[%s3831_s3 + $0x50] sm:$0xff] (!%p291_p9)   ;;  %v3029_v27 = vld [vmem:[%s3831_s3 + $0x58] sm:$0xff] (!%p291_p9)   ;;  %s3130_s16 = smov (!%p291_p9), [#allocation3]  }
  0x12   : > { %716 = vst.msk [vmem:[#allocation2 + $0x28] sm:$0x3] (!%p291_p9), %vm711_vm2, %v3129_v18  ;;  %720 = vst.msk [vmem:[#allocation2 + $0x48] sm:$0x3] (!%p291_p9), %vm711_vm2, %v3129_v18  ;;  %2733 = vmatprep.subr.bf16.mxu1 (!%p291_p9), %v3025_v25  ;;  %v3445_v28 = vld [vmem:[%s3831_s3 + $0x60] sm:$0xff] (!%p291_p9)   ;;  %s3069_s17 = sshll.u32 (!%p291_p9), %s3130_s16, 4  ;;  %s3070_s17 = int_to_ptr.vmem [resolvable:$false] %s3069_s17 }
  0x13   : > { %2666 = vmatpush3.bf16.msra.mxu0 (!%p291_p9), %v3002_v1  ;;  %721 = vst.msk [vmem:[#allocation2 + $0x50] sm:$0xff] (!%p291_p9), %vm709_vm1, %v3129_v18  ;;  %723 = vst.msk [vmem:[#allocation2 + $0x60] sm:$0xff] (!%p291_p9), %vm709_vm1, %v3129_v18  ;;  %v3451_v29 = vld [vmem:[%s3830_s2] ss:$0 sm:$0xff] (!%p291_p9)  ;;  %s3071_s21 = scalar_lea.vmem (!%p291_p9), %s3070_s17, 2048 }
  0x14   : > { %722 = vst.msk [vmem:[#allocation2 + $0x58] sm:$0x3] (!%p291_p9), %vm711_vm2, %v3129_v18  ;;  %724 = vst.msk [vmem:[#allocation2 + $0x68] sm:$0x3] (!%p291_p9), %vm711_vm2, %v3129_v18  ;;  %2699 = vmatprep.subr.bf16.mxu0 (!%p291_p9), %v3019_v19 }
  0x15   : > { %s327_s25 = scalar_select %p326_p10, %s3204_s13, 1  ;;  %725 = vst.msk [vmem:[#allocation2 + $0x70] sm:$0xff] %vm709_vm1, %v3129_v18  ;;  %727 = vst.msk [vmem:[#allocation2 + $0x80] sm:$0xff] %vm709_vm1, %v3129_v18  ;;  %2734 = vmatpush3.bf16.msra.mxu1 %v3025_v25 }
  0x16   : > { %726 = vst.msk [vmem:[#allocation2 + $0x78] sm:$0x3] %vm711_vm2, %v3129_v18  ;;  %728 = vst.msk [vmem:[#allocation2 + $0x88] sm:$0x3] %vm711_vm2, %v3129_v18  ;;  %2735 = vmatprep.subr.bf16.mxu1 %v3027_v26  ;;  %s3787_s13 = scalar_lea.sflag [#allocation4], %s323_s22 }
  0x17   : > { %s2557_s26 = sshll.u32 %s327_s25, 7  ;;  %733 = vst.msk [vmem:[#allocation2 + $0xb0] sm:$0xff] %vm709_vm1, %v3129_v18  ;;  %735 = vst.msk [vmem:[#allocation2 + $0xc0] sm:$0xff] %vm709_vm1, %v3129_v18 }
  0x18   : > { %s3242_s29 = scalar_lea.vmem %s3828_s0, %s2557_s26  ;;  %734 = vst.msk [vmem:[#allocation2 + $0xb8] sm:$0x3] %vm711_vm2, %v3129_v18  ;;  %736 = vst.msk [vmem:[#allocation2 + $0xc8] sm:$0x3] %vm711_vm2, %v3129_v18 }
  0x19   : > { %v3003_v2 = vld [vmem:[%s3242_s29] sm:$0xff]   ;;  %v3004_v3 = vld [vmem:[%s3242_s29 + $0x8] sm:$0xff]   ;;  %v3005_v4 = vld [vmem:[%s3242_s29 + $0x10] sm:$0xff]   ;;  %737 = vst.msk [vmem:[#allocation2 + $0xd0] sm:$0xff] %vm709_vm1, %v3129_v18  ;;  %2736 = vmatpush3.bf16.msra.mxu1 %v3027_v26 }
  0x1a   : > { %2667 = vmatprep.mubr.msk.bf16.mxu0 %vm467_vm0, %v3003_v2  ;;  %v3006_v5 = vld [vmem:[%s3242_s29 + $0x18] sm:$0xff]   ;;  %v3007_v6 = vld [vmem:[%s3242_s29 + $0x20] sm:$0xff]   ;;  %v3008_v7 = vld [vmem:[%s3242_s29 + $0x28] sm:$0xff]   ;;  %738 = vst.msk [vmem:[#allocation2 + $0xd8] sm:$0x3] %vm711_vm2, %v3129_v18  ;;  %2737 = vmatprep.subr.bf16.mxu1 %v3029_v27 }
  0x1b   : > { %2668 = vmatmul.mubr.msk.bf16.vlgmr.msra.gmra.mrb[0].mxu0 %vm467_vm0, %v3004_v3  ;;  %v3009_v8 = vld [vmem:[%s3242_s29 + $0x30] sm:$0xff]   ;;  %v3010_v9 = vld [vmem:[%s3242_s29 + $0x38] sm:$0xff]   ;;  %v3011_v10 = vld [vmem:[%s3242_s29 + $0x40] sm:$0xff]   ;;  %739 = vst.msk [vmem:[#allocation2 + $0xe0] sm:$0xff] %vm709_vm1, %v3129_v18 }
  0x1c   : > { %2671 = vmatprep.mubr.msk.bf16.mxu0 %vm467_vm0, %v3005_v4  ;;  %v3012_v11 = vld [vmem:[%s3242_s29 + $0x48] sm:$0xff]   ;;  %v3013_v12 = vld [vmem:[%s3242_s29 + $0x50] sm:$0xff]   ;;  %v3014_v13 = vld [vmem:[%s3242_s29 + $0x58] sm:$0xff]   ;;  %740 = vst.msk [vmem:[#allocation2 + $0xe8] sm:$0x3] %vm711_vm2, %v3129_v18  ;;  %2700 = vmatpush3.bf16.msra.mxu0 %v3019_v19 }
  0x1d   : > { %v3015_v14 = vld [vmem:[%s3242_s29 + $0x60] sm:$0xff]   ;;  %v3016_v15 = vld [vmem:[%s3242_s29 + $0x68] sm:$0xff]   ;;  %v3017_v16 = vld [vmem:[%s3242_s29 + $0x70] sm:$0xff]   ;;  %741 = vst.msk [vmem:[#allocation2 + $0xf0] sm:$0xff] %vm709_vm1, %v3129_v18  ;;  %2701 = vmatprep.subr.bf16.mxu0 %v3020_v20  ;;  %2738 = vmatpush3.bf16.msra.mxu1 %v3029_v27 }
  0x1e   : > { %v3018_v17 = vld [vmem:[%s3242_s29 + $0x78] sm:$0xff]   ;;  %742 = vst.msk [vmem:[#allocation2 + $0xf8] sm:$0x3] %vm711_vm2, %v3129_v18  ;;  %744 = vst.msk [vmem:[#allocation2 + $0x108] sm:$0x3] %vm711_vm2, %v3129_v18  ;;  %2747 = vmatprep.subr.bf16.mxu1 %v3445_v28 }
  0x1f   : > { %743 = vst.msk [vmem:[#allocation2 + $0x100] sm:$0xff] %vm709_vm1, %v3129_v18  ;;  %745 = vst.msk [vmem:[#allocation2 + $0x110] sm:$0xff] %vm709_vm1, %v3129_v18 }
  0x20   : > { %746 = vst.msk [vmem:[#allocation2 + $0x118] sm:$0x3] %vm711_vm2, %v3129_v18  ;;  %748 = vst.msk [vmem:[#allocation2 + $0x128] sm:$0x3] %vm711_vm2, %v3129_v18  ;;  %2702 = vmatpush3.bf16.msra.mxu0 %v3020_v20 }
  0x21   : > { %747 = vst.msk [vmem:[#allocation2 + $0x120] sm:$0xff] %vm709_vm1, %v3129_v18  ;;  %751 = vst.msk [vmem:[#allocation2 + $0x140] sm:$0xff] %vm709_vm1, %v3129_v18  ;;  %2703 = vmatprep.subr.bf16.mxu0 %v3021_v21 }
  0x22   : > { %752 = vst.msk [vmem:[#allocation2 + $0x148] sm:$0x3] %vm711_vm2, %v3129_v18  ;;  %754 = vst.msk [vmem:[#allocation2 + $0x158] sm:$0x3] %vm711_vm2, %v3129_v18 }
  0x23   : > { %2672 = vmatmul.mubr.msk.bf16.gmra.mrb[4].mxu0 %vm467_vm0, %v3006_v5  ;;  %753 = vst.msk [vmem:[#allocation2 + $0x150] sm:$0xff] %vm709_vm1, %v3129_v18  ;;  %755 = vst.msk [vmem:[#allocation2 + $0x160] sm:$0xff] %vm709_vm1, %v3129_v18 }
  0x24   : > { %2675 = vmatprep.mubr.msk.bf16.mxu0 %vm467_vm0, %v3007_v6  ;;  %756 = vst.msk [vmem:[#allocation2 + $0x168] sm:$0x3] %vm711_vm2, %v3129_v18  ;;  %758 = vst.msk [vmem:[#allocation2 + $0x178] sm:$0x3] %vm711_vm2, %v3129_v18  ;;  %2704 = vmatpush3.bf16.msra.mxu0 %v3021_v21 }
  0x25   : > { %757 = vst.msk [vmem:[#allocation2 + $0x170] sm:$0xff] %vm709_vm1, %v3129_v18  ;;  %759 = vst.msk [vmem:[#allocation2 + $0x180] sm:$0xff] %vm709_vm1, %v3129_v18  ;;  %2705 = vmatprep.subr.bf16.mxu0 %v3022_v22 }
  0x26   : > { %760 = vst.msk [vmem:[#allocation2 + $0x188] sm:$0x3] %vm711_vm2, %v3129_v18  ;;  %762 = vst.msk [vmem:[#allocation2 + $0x198] sm:$0x3] %vm711_vm2, %v3129_v18 }
  0x27   : > { %761 = vst.msk [vmem:[#allocation2 + $0x190] sm:$0xff] %vm709_vm1, %v3129_v18  ;;  %763 = vst.msk [vmem:[#allocation2 + $0x1a0] sm:$0xff] %vm709_vm1, %v3129_v18 }
  0x28   : > { %764 = vst.msk [vmem:[#allocation2 + $0x1a8] sm:$0x3] %vm711_vm2, %v3129_v18  ;;  %766 = vst.msk [vmem:[#allocation2 + $0x1b8] sm:$0x3] %vm711_vm2, %v3129_v18  ;;  %2706 = vmatpush3.bf16.msra.mxu0 %v3022_v22 }
  0x29   : > { %765 = vst.msk [vmem:[#allocation2 + $0x1b0] sm:$0xff] %vm709_vm1, %v3129_v18  ;;  %767 = vst.msk [vmem:[#allocation2 + $0x1c0] sm:$0xff] %vm709_vm1, %v3129_v18  ;;  %2715 = vmatprep.subr.bf16.mxu0 %v3430_v24 }
  0x2a   : > { %768 = vst.msk [vmem:[#allocation2 + $0x1c8] sm:$0x3] %vm711_vm2, %v3129_v18  ;;  %772 = vst.msk [vmem:[#allocation2 + $0x1e8] sm:$0x3] %vm711_vm2, %v3129_v18 }
  0x2b   : > { %2676 = vmatmul.mubr.msk.bf16.gmra.mrb[8].mxu0 %vm467_vm0, %v3008_v7  ;;  %771 = vst.msk [vmem:[#allocation2 + $0x1e0] sm:$0xff] %vm709_vm1, %v3129_v18  ;;  %773 = vst.msk [vmem:[#allocation2 + $0x1f0] sm:$0xff] %vm709_vm1, %v3129_v18 }
  0x2c   : > { %2679 = vmatprep.mubr.msk.bf16.mxu0 %vm467_vm0, %v3009_v8  ;;  %774 = vst.msk [vmem:[#allocation2 + $0x1f8] sm:$0x3] %vm711_vm2, %v3129_v18  ;;  %776 = vst.msk [vmem:[#allocation2 + $0x208] sm:$0x3] %vm711_vm2, %v3129_v18 }
  0x2d   : > { %775 = vst.msk [vmem:[#allocation2 + $0x200] sm:$0xff] %vm709_vm1, %v3129_v18  ;;  %777 = vst.msk [vmem:[#allocation2 + $0x210] sm:$0xff] %vm709_vm1, %v3129_v18 }
  0x2e   : > { %778 = vst.msk [vmem:[#allocation2 + $0x218] sm:$0x3] %vm711_vm2, %v3129_v18  ;;  %780 = vst.msk [vmem:[#allocation2 + $0x228] sm:$0x3] %vm711_vm2, %v3129_v18 }
  0x2f   : > { %779 = vst.msk [vmem:[#allocation2 + $0x220] sm:$0xff] %vm709_vm1, %v3129_v18  ;;  %781 = vst.msk [vmem:[#allocation2 + $0x230] sm:$0xff] %vm709_vm1, %v3129_v18 }
  0x30   : > { %782 = vst.msk [vmem:[#allocation2 + $0x238] sm:$0x3] %vm711_vm2, %v3129_v18  ;;  %784 = vst.msk [vmem:[#allocation2 + $0x248] sm:$0x3] %vm711_vm2, %v3129_v18 }
  0x31   : > { %783 = vst.msk [vmem:[#allocation2 + $0x240] sm:$0xff] %vm709_vm1, %v3129_v18  ;;  %785 = vst.msk [vmem:[#allocation2 + $0x250] sm:$0xff] %vm709_vm1, %v3129_v18 }
  0x32   : > { %786 = vst.msk [vmem:[#allocation2 + $0x258] sm:$0x3] %vm711_vm2, %v3129_v18  ;;  %788 = vst.msk [vmem:[#allocation2 + $0x268] sm:$0x3] %vm711_vm2, %v3129_v18 }
  0x33   : > { %2680 = vmatmul.mubr.msk.bf16.gmra.mrb[12].mxu0 %vm467_vm0, %v3010_v9  ;;  %787 = vst.msk [vmem:[#allocation2 + $0x260] sm:$0xff] %vm709_vm1, %v3129_v18 }
  0x34   : > { %2683 = vmatprep.mubr.msk.bf16.mxu0 %vm467_vm0, %v3011_v10 }
  0x3b   : > { %2684 = vmatmul.mubr.msk.bf16.gmra.mrb[16].mxu0 %vm467_vm0, %v3012_v11 }
  0x3c   : > { %2687 = vmatprep.mubr.msk.bf16.mxu0 %vm467_vm0, %v3013_v12 }
  0x43   : > { %2688 = vmatmul.mubr.msk.bf16.gmra.mrb[20].mxu0 %vm467_vm0, %v3014_v13 }
  0x44   : > { %2691 = vmatprep.mubr.msk.bf16.mxu0 %vm467_vm0, %v3015_v14 }
  0x4b   : > { %2692 = vmatmul.mubr.msk.bf16.gmra.mrb[24].mxu0 %vm467_vm0, %v3016_v15 }
  0x4c   : > { %2695 = vmatprep.mubr.msk.bf16.mxu0 %vm467_vm0, %v3017_v16 }
  0x53   : > { %2696 = vmatmul.mubr.msk.bf16.gmra.mrb[28].mxu0 %vm467_vm0, %v3018_v17 }
  0xee   : > { %v2669_v30 = vpop.f32.mrb[0].mxu0 }
  0xef   : > { %v559_v31 = vadd.f32 %v2669_v30, %v3451_v29  ;;  %v550_v32 = vpop.f32.mrb[1].mxu0 }
  0xf0   : > { %v551_v33 = vadd.f32 %v3451_v29, %v550_v32  ;;  %v2670_v34 = vpop.f32.mrb[2].mxu0 }
  0xf1   : > { %v679_v35 = vmax.f32 %v559_v31, 0.0  ;;  %v562_v36 = vadd.f32 %v2670_v34, %v3451_v29  ;;  %v553_v37 = vpop.f32.mrb[3].mxu0 }
  0xf2   : > { %v677_v38 = vmax.f32 %v551_v33, 0.0  ;;  %v554_v39 = vadd.f32 %v3451_v29, %v553_v37  ;;  %v849_v37 = vld [vmem:[#allocation2 + $0x141] sm:$0xff] }
  0xf3   : > { %794 = vst.msk [vmem:[#allocation2 + $0x31] sm:$0xff] %vm709_vm1, %v679_v35  ;;  %v680_v40 = vmax.f32 %v562_v36, 0.0 }
  0xf4   : > { %792 = vst.msk [vmem:[#allocation2 + $0x11] sm:$0xff] %vm709_vm1, %v677_v38  ;;  %v678_v41 = vmax.f32 %v554_v39, 0.0 }
  0xf5   : > { %795 = vst.msk [vmem:[#allocation2 + $0x41] sm:$0xff] %vm709_vm1, %v680_v40 }
  0xf6   : > { %793 = vst.msk [vmem:[#allocation2 + $0x21] sm:$0xff] %vm709_vm1, %v678_v41  ;;  %v2673_v42 = vpop.f32.mrb[4].mxu0 }
  0xf7   : > { %v575_v43 = vadd.f32 %v2673_v42, %v3451_v29  ;;  %v566_v44 = vpop.f32.mrb[5].mxu0 }
  0xf8   : > { %v567_v45 = vadd.f32 %v3451_v29, %v566_v44  ;;  %v2674_v46 = vpop.f32.mrb[6].mxu0 }
  0xf9   : > { %v683_v47 = vmax.f32 %v575_v43, 0.0  ;;  %v578_v48 = vadd.f32 %v2674_v46, %v3451_v29  ;;  %v569_v49 = vpop.f32.mrb[7].mxu0 }
  0xfa   : > { %v681_v50 = vmax.f32 %v567_v45, 0.0  ;;  %v570_v51 = vadd.f32 %v3451_v29, %v569_v49 }
  0xfb   : > { %798 = vst.msk [vmem:[#allocation2 + $0x71] sm:$0xff] %vm709_vm1, %v683_v47  ;;  %v684_v52 = vmax.f32 %v578_v48, 0.0 }
  0xfc   : > { %796 = vst.msk [vmem:[#allocation2 + $0x51] sm:$0xff] %vm709_vm1, %v681_v50  ;;  %v682_v53 = vmax.f32 %v570_v51, 0.0  ;;  %v3026_v50 = vld [vmem:[%s3831_s3 + $0x8] sm:$0xff]  }
  0xfd   : > { %799 = vst.msk [vmem:[#allocation2 + $0x81] sm:$0xff] %vm709_vm1, %v684_v52 }
  0xfe   : > { %797 = vst.msk [vmem:[#allocation2 + $0x61] sm:$0xff] %vm709_vm1, %v682_v53  ;;  %v2677_v54 = vpop.f32.mrb[8].mxu0 }
  0xff   : > { %v591_v55 = vadd.f32 %v2677_v54, %v3451_v29  ;;  %v582_v56 = vpop.f32.mrb[9].mxu0 }
 0x100   : > { %v583_v57 = vadd.f32 %v3451_v29, %v582_v56  ;;  %v2678_v58 = vpop.f32.mrb[10].mxu0 }
 0x101   : > { %v687_v59 = vmax.f32 %v591_v55, 0.0  ;;  %v594_v60 = vadd.f32 %v2678_v58, %v3451_v29  ;;  %v585_v61 = vpop.f32.mrb[11].mxu0 }
 0x102   : > { %v685_v62 = vmax.f32 %v583_v57, 0.0  ;;  %v586_v63 = vadd.f32 %v3451_v29, %v585_v61  ;;  %v3028_v61 = vld [vmem:[%s3831_s3 + $0x10] sm:$0xff]  }
 0x103   : > { %803 = vst.msk [vmem:[#allocation2 + $0xd1] sm:$0xff] %vm709_vm1, %v687_v59  ;;  %v688_v0 = vmax.f32 %v594_v60, 0.0 }
 0x104   : > { %801 = vst.msk [vmem:[#allocation2 + $0xb1] sm:$0xff] %vm709_vm1, %v685_v62  ;;  %v686_v1 = vmax.f32 %v586_v63, 0.0 }
 0x105   : > { %804 = vst.msk [vmem:[#allocation2 + $0xe1] sm:$0xff] %vm709_vm1, %v688_v0 }
 0x106   : > { %802 = vst.msk [vmem:[#allocation2 + $0xc1] sm:$0xff] %vm709_vm1, %v686_v1  ;;  %v2681_v2 = vpop.f32.mrb[12].mxu0 }
 0x107   : > { %v607_v3 = vadd.f32 %v2681_v2, %v3451_v29  ;;  %v598_v4 = vpop.f32.mrb[13].mxu0 }
 0x108   : > { %v599_v5 = vadd.f32 %v3451_v29, %v598_v4  ;;  %v2682_v6 = vpop.f32.mrb[14].mxu0 }
 0x109   : > { %v691_v7 = vmax.f32 %v607_v3, 0.0  ;;  %v610_v8 = vadd.f32 %v2682_v6, %v3451_v29  ;;  %v601_v9 = vpop.f32.mrb[15].mxu0 }
 0x10a   : > { %v689_v10 = vmax.f32 %v599_v5, 0.0  ;;  %v602_v11 = vadd.f32 %v3451_v29, %v601_v9  ;;  %v3030_v5 = vld [vmem:[%s3831_s3 + $0x18] sm:$0xff]  }
 0x10b   : > { %807 = vst.msk [vmem:[#allocation2 + $0x111] sm:$0xff] %vm709_vm1, %v691_v7  ;;  %v692_v12 = vmax.f32 %v610_v8, 0.0 }
 0x10c   : > { %805 = vst.msk [vmem:[#allocation2 + $0xf1] sm:$0xff] %vm709_vm1, %v689_v10  ;;  %v690_v13 = vmax.f32 %v602_v11, 0.0 }
 0x10d   : > { %808 = vst.msk [vmem:[#allocation2 + $0x121] sm:$0xff] %vm709_vm1, %v692_v12 }
 0x10e   : > { %806 = vst.msk [vmem:[#allocation2 + $0x101] sm:$0xff] %vm709_vm1, %v690_v13  ;;  %v2685_v14 = vpop.f32.mrb[16].mxu0 }
 0x10f   : > { %v623_v15 = vadd.f32 %v2685_v14, %v3451_v29  ;;  %v614_v16 = vpop.f32.mrb[17].mxu0  ;;  %v828_v14 = vld [vmem:[#allocation2 + $0x1e0] sm:$0xff] }
 0x110   : > { %v615_v17 = vadd.f32 %v3451_v29, %v614_v16  ;;  %v2686_v18 = vpop.f32.mrb[18].mxu0 }
 0x111   : > { %v695_v19 = vmax.f32 %v623_v15, 0.0  ;;  %v626_v20 = vadd.f32 %v2686_v18, %v3451_v29  ;;  %v617_v21 = vpop.f32.mrb[19].mxu0  ;;  %v1072_v15 = vld [vmem:[#allocation2 + $0x1e1] sm:$0xff] }
 0x112   : > { %v693_v22 = vmax.f32 %v615_v17, 0.0  ;;  %v618_v23 = vadd.f32 %v3451_v29, %v617_v21 }
 0x113   : > { %812 = vst.msk [vmem:[#allocation2 + $0x171] sm:$0xff] %vm709_vm1, %v695_v19  ;;  %v696_v25 = vmax.f32 %v626_v20, 0.0 }
 0x114   : > { %810 = vst.msk [vmem:[#allocation2 + $0x151] sm:$0xff] %vm709_vm1, %v693_v22  ;;  %v694_v26 = vmax.f32 %v618_v23, 0.0 }
 0x115   : > { %813 = vst.msk [vmem:[#allocation2 + $0x181] sm:$0xff] %vm709_vm1, %v696_v25 }
 0x116   : > { %811 = vst.msk [vmem:[#allocation2 + $0x161] sm:$0xff] %vm709_vm1, %v694_v26  ;;  %v2689_v27 = vpop.f32.mrb[20].mxu0 }
 0x117   : > { %v639_v30 = vadd.f32 %v2689_v27, %v3451_v29  ;;  %v630_v31 = vpop.f32.mrb[21].mxu0 }
 0x118   : > { %v631_v32 = vadd.f32 %v3451_v29, %v630_v31  ;;  %v2690_v33 = vpop.f32.mrb[22].mxu0 }
 0x119   : > { %v699_v34 = vmax.f32 %v639_v30, 0.0  ;;  %v642_v35 = vadd.f32 %v2690_v33, %v3451_v29  ;;  %v633_v36 = vpop.f32.mrb[23].mxu0 }
 0x11a   : > { %v697_v38 = vmax.f32 %v631_v32, 0.0  ;;  %v634_v39 = vadd.f32 %v3451_v29, %v633_v36  ;;  %v3502_v44 = vld [vmem:[#allocation2 + $0x171] sm:$0xff] }
 0x11b   : > { %816 = vst.msk [vmem:[#allocation2 + $0x1b1] sm:$0xff] %vm709_vm1, %v699_v34  ;;  %v700_v40 = vmax.f32 %v642_v35, 0.0  ;;  %v3498_v41 = vld [vmem:[#allocation2 + $0x151] sm:$0xff]  ;;  %v3032_v34 = vld [vmem:[%s3831_s3 + $0x68] sm:$0xff]  }
 0x11c   : > { %814 = vst.msk [vmem:[#allocation2 + $0x191] sm:$0xff] %vm709_vm1, %v697_v38  ;;  %v698_v42 = vmax.f32 %v634_v39, 0.0  ;;  %v857_v43 = vpack.c.bf16 %v3498_v41, %v849_v37  ;;  %v3504_v45 = vld [vmem:[#allocation2 + $0x181] sm:$0xff]  ;;  %v3033_v36 = vld [vmem:[%s3831_s3 + $0x70] sm:$0xff]  }
 0x11d   : > { %817 = vst.msk [vmem:[#allocation2 + $0x1c1] sm:$0xff] %vm709_vm1, %v700_v40  ;;  %v3507_v46 = vld [vmem:[#allocation2 + $0x161] sm:$0xff]  ;;  %v1731_v47 = vpack.c.bf16 %v3504_v45, %v3502_v44 }
 0x11e   : > { %815 = vst.msk [vmem:[#allocation2 + $0x1a1] sm:$0xff] %vm709_vm1, %v698_v42  ;;  %v2693_v48 = vpop.f32.mrb[24].mxu0  ;;  %2707 = vmatprep.mubr.msk.bf16.mxu0 %vm709_vm1, %v857_v43  ;;  %v858_v49 = vpack.c.bf16 %v3502_v44, %v3507_v46  ;;  %v1730_v51 = vpack.c.bf16 %v3507_v46, %v3498_v41  ;;  %v3053_v41 = vld [vmem:[%s3831_s3 + $0x110] sm:$0xff]   ;;  %v3054_v44 = vld [vmem:[%s3831_s3 + $0x118] sm:$0xff]  }
 0x11f   : > { %v655_v52 = vadd.f32 %v2693_v48, %v3451_v29  ;;  %v646_v53 = vpop.f32.mrb[25].mxu0 }
 0x120   : > { %v647_v54 = vadd.f32 %v3451_v29, %v646_v53  ;;  %v2694_v55 = vpop.f32.mrb[26].mxu0  ;;  %2708 = vmatmul.mubr.msk.bf16.vlgmr.msra.gmra.mrb[32].mxu0 %vm709_vm1, %v858_v49 }
 0x121   : > { %v703_v56 = vmax.f32 %v655_v52, 0.0  ;;  %v658_v57 = vadd.f32 %v2694_v55, %v3451_v29  ;;  %v649_v58 = vpop.f32.mrb[27].mxu0  ;;  %2716 = vmatpush3.bf16.msra.mxu0 %v3430_v24  ;;  %v3034_v55 = vld [vmem:[%s3831_s3 + $0x78] sm:$0xff]  }
 0x122   : > { %v701_v59 = vmax.f32 %v647_v54, 0.0  ;;  %v650_v60 = vadd.f32 %v3451_v29, %v649_v58  ;;  %2717 = vmatprep.subr.bf16.mxu0 %v3026_v50  ;;  %v3538_v2 = vld [vmem:[#allocation2 + $0x1b1] sm:$0xff]  ;;  %v3035_v58 = vld [vmem:[%s3831_s3 + $0x80] sm:$0xff]  }
 0x123   : > { %821 = vst.msk [vmem:[#allocation2 + $0x211] sm:$0xff] %vm709_vm1, %v703_v56  ;;  %v704_v62 = vmax.f32 %v658_v57, 0.0  ;;  %v3530_v63 = vld [vmem:[#allocation2 + $0x191] sm:$0xff] }
 0x124   : > { %819 = vst.msk [vmem:[#allocation2 + $0x1f1] sm:$0xff] %vm709_vm1, %v701_v59  ;;  %v702_v0 = vmax.f32 %v650_v60, 0.0  ;;  %v859_v1 = vpack.c.bf16 %v3530_v63, %v3504_v45  ;;  %v1202_v54 = vld [vmem:[#allocation2 + $0xb0] sm:$0xff]  ;;  %v1205_v59 = vld [vmem:[#allocation2 + $0xe0] sm:$0xff] }
 0x125   : > { %822 = vst.msk [vmem:[#allocation2 + $0x221] sm:$0xff] %vm709_vm1, %v704_v62  ;;  %2718 = vmatpush3.bf16.msra.mxu0 %v3026_v50  ;;  %v3536_v24 = vld [vmem:[#allocation2 + $0x1a1] sm:$0xff] }
 0x126   : > { %820 = vst.msk [vmem:[#allocation2 + $0x201] sm:$0xff] %vm709_vm1, %v702_v0  ;;  %v2697_v3 = vpop.f32.mrb[28].mxu0  ;;  %2711 = vmatprep.mubr.msk.bf16.mxu0 %vm709_vm1, %v859_v1  ;;  %v860_v4 = vpack.c.bf16 %v3538_v2, %v3536_v24  ;;  %2719 = vmatprep.subr.bf16.mxu0 %v3028_v61  ;;  %v1732_v6 = vpack.c.bf16 %v3536_v24, %v3530_v63  ;;  %v1207_v60 = vld [vmem:[#allocation2 + $0x100] sm:$0xff]  ;;  %v1206_v0 = vld [vmem:[#allocation2 + $0xf0] sm:$0xff]  ;;  %v3036_v1 = vld [vmem:[%s3831_s3 + $0x88] sm:$0xff]  }
 0x127   : > { %v671_v7 = vadd.f32 %v2697_v3, %v3451_v29  ;;  %v662_v8 = vpop.f32.mrb[29].mxu0  ;;  %v1212_v3 = vpack.c.bf16 %v1207_v60, %v1206_v0  ;;  %v1468_v0 = vld [vmem:[#allocation2 + $0x111] sm:$0xff]  ;;  %v1729_v46 = vld [vmem:[#allocation2 + $0x1c1] sm:$0xff] }
 0x128   : > { %v663_v9 = vadd.f32 %v3451_v29, %v662_v8  ;;  %v2698_v10 = vpop.f32.mrb[30].mxu0  ;;  %2712 = vmatmul.mubr.msk.bf16.gmra.mrb[36].mxu0 %vm709_vm1, %v860_v4  ;;  %v3037_v4 = vld [vmem:[%s3831_s3 + $0x90] sm:$0xff]   ;;  %v3055_v45 = vld [vmem:[%s3833_s5] sm:$0xff]   ;;  %v3056_v24 = vld [vmem:[%s3833_s5 + $0x8] sm:$0xff]  }
 0x129   : > { %v707_v11 = vmax.f32 %v671_v7, 0.0  ;;  %v674_v12 = vadd.f32 %v2698_v10, %v3451_v29  ;;  %v665_v13 = vpop.f32.mrb[31].mxu0  ;;  %2720 = vmatpush3.bf16.msra.mxu0 %v3028_v61  ;;  %v1204_v61 = vld [vmem:[#allocation2 + $0xd0] sm:$0xff]  ;;  %v1333_v7 = vld [vmem:[#allocation2 + $0x21] sm:$0xff] }
 0x12a   : > { %v705_v16 = vmax.f32 %v663_v9, 0.0  ;;  %v666_v17 = vadd.f32 %v3451_v29, %v665_v13  ;;  %2721 = vmatprep.subr.bf16.mxu0 %v3030_v5  ;;  %v3562_v25 = vld [vmem:[#allocation2 + $0x211] sm:$0xff]  ;;  %v1211_v62 = vpack.c.bf16 %v1205_v59, %v1204_v61  ;;  %v3039_v13 = vld [vmem:[%s3831_s3 + $0xa0] sm:$0xff]   ;;  %v3044_v59 = vld [vmem:[%s3831_s3 + $0xc8] sm:$0xff]  }
 0x12b   : > { %825 = vst.msk [vmem:[#allocation2 + $0x251] sm:$0xff] %vm709_vm1, %v707_v11  ;;  %v708_v18 = vmax.f32 %v674_v12, 0.0  ;;  %v3555_v19 = vld [vmem:[#allocation2 + $0x1f0] sm:$0xff]  ;;  %v3038_v11 = vld [vmem:[%s3831_s3 + $0x98] sm:$0xff]  }
 0x12c   : > { %v3557_v20 = vld [vmem:[#allocation2 + $0x1f1] sm:$0xff]  ;;  %823 = vst.msk [vmem:[#allocation2 + $0x231] sm:$0xff] %vm709_vm1, %v705_v16  ;;  %v706_v21 = vmax.f32 %v666_v17, 0.0  ;;  %v836_v22 = vpack.c.bf16 %v3555_v19, %v828_v14  ;;  %v3564_v26 = vld [vmem:[#allocation2 + $0x221] sm:$0xff] }
 0x12d   : > { %v1080_v23 = vpack.c.bf16 %v3557_v20, %v1072_v15  ;;  %826 = vst.msk [vmem:[#allocation2 + $0x261] sm:$0xff] %vm709_vm1, %v708_v18  ;;  %2722 = vmatpush3.bf16.msra.mxu0 %v3030_v5  ;;  %v3567_v29 = vld [vmem:[#allocation2 + $0x200] sm:$0xff]  ;;  %v3569_v27 = vld [vmem:[#allocation2 + $0x210] sm:$0xff]  ;;  %v1861_v31 = vpack.c.bf16 %v3564_v26, %v3562_v25 }
 0x12e   : > { %v3571_v30 = vld [vmem:[#allocation2 + $0x201] sm:$0xff]  ;;  %824 = vst.msk [vmem:[#allocation2 + $0x241] sm:$0xff] %vm709_vm1, %v706_v21  ;;  %2723 = vmatprep.mubr.msk.bf16.mxu0 %vm709_vm1, %v836_v22  ;;  %v837_v32 = vpack.c.bf16 %v3569_v27, %v3567_v29  ;;  %v1208_v8 = vld [vmem:[#allocation2 + $0x110] sm:$0xff]  ;;  %2843 = vmatprep.subr.bf16.mxu0 %v3055_v45 }
 0x12f   : > { %2739 = vmatprep.mubr.msk.bf16.mxu1 %vm709_vm1, %v1080_v23  ;;  %v1081_v33 = vpack.c.bf16 %v3562_v25, %v3571_v30  ;;  %v1860_v35 = vpack.c.bf16 %v3571_v30, %v3557_v20  ;;  %v3593_v37 = vld [vmem:[#allocation2 + $0x220] sm:$0xff]  ;;  %v1332_v10 = vld [vmem:[#allocation2 + $0x11] sm:$0xff]  ;;  %v3040_v21 = vld [vmem:[%s3831_s3 + $0xa8] sm:$0xff]  }
 0x130   : > { %2724 = vmatmul.mubr.msk.bf16.vlgmr.msra.gmra.mrb[32].mxu0 %vm709_vm1, %v837_v32  ;;  %v1209_v5 = vld [vmem:[#allocation2 + $0x120] sm:$0xff]  ;;  %v1340_v12 = vpack.c.bf16 %v1333_v7, %v1332_v10  ;;  %v1334_v16 = vld [vmem:[#allocation2 + $0x31] sm:$0xff]  ;;  %v1601_v7 = vpack.c.bf16 %v3593_v37, %v3569_v27 }
 0x131   : > { %2740 = vmatmul.mubr.msk.bf16.vlgmr.msra.gmra.mrb[0].mxu1 %vm709_vm1, %v1081_v33  ;;  %v1213_v9 = vpack.c.bf16 %v1209_v5, %v1208_v8  ;;  %v1335_v14 = vld [vmem:[#allocation2 + $0x41] sm:$0xff]  ;;  %v1336_v18 = vld [vmem:[#allocation2 + $0x51] sm:$0xff]  ;;  %2844 = vmatpush3.bf16.msra.mxu0 %v3055_v45 }
 0x132   : > { %2748 = vmatpush3.bf16.msra.mxu1 %v3445_v28  ;;  %v3603_v43 = vld [vmem:[#allocation2 + $0x250] sm:$0xff]  ;;  %v1203_v28 = vld [vmem:[#allocation2 + $0xc0] sm:$0xff]  ;;  %v1341_v17 = vpack.c.bf16 %v1335_v14, %v1334_v16  ;;  %v3048_v8 = vld [vmem:[%s3831_s3 + $0xe8] sm:$0xff]   ;;  %2845 = vmatprep.subr.bf16.mxu0 %v3056_v24 }
 0x133   : > { %2749 = vmatprep.subr.bf16.mxu1 %v3032_v34  ;;  %v3595_v38 = vld [vmem:[#allocation2 + $0x230] sm:$0xff]  ;;  %v1210_v56 = vpack.c.bf16 %v1203_v28, %v1202_v54  ;;  %v1337_v15 = vld [vmem:[#allocation2 + $0x61] sm:$0xff] }
 0x134   : > { %v3597_v39 = vld [vmem:[#allocation2 + $0x231] sm:$0xff]  ;;  %v838_v40 = vpack.c.bf16 %v3595_v38, %v3593_v37  ;;  %v1342_v22 = vpack.c.bf16 %v1337_v15, %v1336_v18  ;;  %v1339_v32 = vld [vmem:[#allocation2 + $0x81] sm:$0xff] }
 0x135   : > { %v1082_v42 = vpack.c.bf16 %v3597_v39, %v3564_v26  ;;  %v3605_v48 = vld [vmem:[#allocation2 + $0x240] sm:$0xff]  ;;  %v3609_v50 = vld [vmem:[#allocation2 + $0x251] sm:$0xff]  ;;  %2846 = vmatpush3.bf16.msra.mxu0 %v3056_v24 }
 0x136   : > { %2750 = vmatpush3.bf16.msra.mxu1 %v3032_v34  ;;  %v3607_v49 = vld [vmem:[#allocation2 + $0x241] sm:$0xff]  ;;  %2727 = vmatprep.mubr.msk.bf16.mxu0 %vm709_vm1, %v838_v40  ;;  %v839_v52 = vpack.c.bf16 %v3603_v43, %v3605_v48  ;;  %v3041_v23 = vld [vmem:[%s3831_s3 + $0xb0] sm:$0xff]   ;;  %v3050_v37 = vld [vmem:[%s3831_s3 + $0xf8] sm:$0xff]  }
 0x137   : > { %2743 = vmatprep.mubr.msk.bf16.mxu1 %vm709_vm1, %v1082_v42  ;;  %v1083_v53 = vpack.c.bf16 %v3609_v50, %v3607_v49  ;;  %2751 = vmatprep.subr.bf16.mxu1 %v3033_v36  ;;  %v1862_v57 = vpack.c.bf16 %v3607_v49, %v3597_v39  ;;  %v1463_v33 = vld [vmem:[#allocation2 + $0xc1] sm:$0xff]  ;;  %v1338_v34 = vld [vmem:[#allocation2 + $0x71] sm:$0xff] }
 0x138   : > { %2728 = vmatmul.mubr.msk.bf16.gmra.mrb[36].mxu0 %vm709_vm1, %v839_v52  ;;  %v1462_v40 = vld [vmem:[#allocation2 + $0xb1] sm:$0xff]  ;;  %v3043_v52 = vld [vmem:[%s3831_s3 + $0xc0] sm:$0xff]  }
 0x139   : > { %2744 = vmatmul.mubr.msk.bf16.gmra.mrb[4].mxu1 %vm709_vm1, %v1083_v53  ;;  %v3042_v42 = vld [vmem:[%s3831_s3 + $0xb8] sm:$0xff]   ;;  %v1470_v28 = vpack.c.bf16 %v1463_v33, %v1462_v40  ;;  %v1465_v53 = vld [vmem:[#allocation2 + $0xe1] sm:$0xff]  ;;  %v3045_v61 = vld [vmem:[%s3831_s3 + $0xd0] sm:$0xff]  }
 0x13a   : > { %2752 = vmatpush3.bf16.msra.mxu1 %v3033_v36  ;;  %2755 = vmatprep.mubr.msk.bf16.mxu1 %vm709_vm1, %v1210_v56  ;;  %v1343_v36 = vpack.c.bf16 %v1339_v32, %v1338_v34  ;;  %v1467_v54 = vld [vmem:[#allocation2 + $0x101] sm:$0xff] }
 0x13b   : > { %2753 = vmatprep.subr.bf16.mxu1 %v3034_v55  ;;  %v3047_v5 = vld [vmem:[%s3831_s3 + $0xe0] sm:$0xff]  }
 0x13c   : > { %v3059_v20 = vld [vmem:[%s3835_s7] sm:$0xff]  }
 0x13e   : > { %2754 = vmatpush3.bf16.msra.mxu1 %v3034_v55  ;;  %v1464_v55 = vld [vmem:[#allocation2 + $0xd1] sm:$0xff] }
 0x13f   : > { %2763 = vmatprep.subr.bf16.mxu1 %v3035_v58  ;;  %v1471_v56 = vpack.c.bf16 %v1465_v53, %v1464_v55 }
 0x141   : > { %2756 = vmatmul.mubr.msk.bf16.vlgmr.msra.gmra.mrb[0].mxu1 %vm709_vm1, %v1211_v62  ;;  %v1469_v62 = vld [vmem:[#allocation2 + $0x121] sm:$0xff] }
 0x142   : > { %2764 = vmatpush3.bf16.msra.mxu1 %v3035_v58  ;;  %2759 = vmatprep.mubr.msk.bf16.mxu1 %vm709_vm1, %v1212_v3  ;;  %v1466_v58 = vld [vmem:[#allocation2 + $0xf1] sm:$0xff] }
 0x143   : > { %2765 = vmatprep.subr.bf16.mxu1 %v3036_v1  ;;  %v1472_v60 = vpack.c.bf16 %v1467_v54, %v1466_v58  ;;  %v3046_v3 = vld [vmem:[%s3831_s3 + $0xd8] sm:$0xff]  }
 0x146   : > { %2766 = vmatpush3.bf16.msra.mxu1 %v3036_v1  ;;  %v1473_v1 = vpack.c.bf16 %v1469_v62, %v1468_v0 }
 0x147   : > { %2767 = vmatprep.subr.bf16.mxu1 %v3037_v4 }
 0x149   : > { %2760 = vmatmul.mubr.msk.bf16.gmra.mrb[4].mxu1 %vm709_vm1, %v1213_v9  ;;  %v1599_v9 = vld [vmem:[#allocation2 + $0x260] sm:$0xff] }
 0x14a   : > { %2768 = vmatpush3.bf16.msra.mxu1 %v3037_v4  ;;  %2771 = vmatprep.mubr.msk.bf16.mxu1 %vm709_vm1, %v1340_v12  ;;  %v1600_v4 = vpack.c.bf16 %v3567_v29, %v3555_v19  ;;  %v1602_v19 = vpack.c.bf16 %v3605_v48, %v3595_v38  ;;  %v3049_v29 = vld [vmem:[%s3831_s3 + $0xf0] sm:$0xff]   ;;  %v1603_v27 = vpack.c.bf16 %v1599_v9, %v3603_v43  ;;  %v3051_v38 = vld [vmem:[%s3831_s3 + $0x100] sm:$0xff]   ;;  %v3052_v43 = vld [vmem:[%s3831_s3 + $0x108] sm:$0xff]  }
 0x14b   : > { %2769 = vmatprep.subr.bf16.mxu1 %v3038_v11  ;;  %v3063_v9 = vld [vmem:[%s3242_s29 + $0x10] sm:$0xff]  }
 0x14e   : > { %2770 = vmatpush3.bf16.msra.mxu1 %v3038_v11 }
 0x14f   : > { %2779 = vmatprep.subr.bf16.mxu1 %v3039_v13 }
 0x151   : > { %2772 = vmatmul.mubr.msk.bf16.vlgmr.msra.gmra.mrb[0].mxu1 %vm709_vm1, %v1341_v17 }
 0x152   : > { %2780 = vmatpush3.bf16.msra.mxu1 %v3039_v13  ;;  %2775 = vmatprep.mubr.msk.bf16.mxu1 %vm709_vm1, %v1342_v22 }
 0x153   : > { %2781 = vmatprep.subr.bf16.mxu1 %v3040_v21 }
 0x156   : > { %2782 = vmatpush3.bf16.msra.mxu1 %v3040_v21 }
 0x157   : > { %2783 = vmatprep.subr.bf16.mxu1 %v3041_v23 }
 0x159   : > { %2776 = vmatmul.mubr.msk.bf16.gmra.mrb[4].mxu1 %vm709_vm1, %v1343_v36 }
 0x15a   : > { %2784 = vmatpush3.bf16.msra.mxu1 %v3041_v23  ;;  %2787 = vmatprep.mubr.msk.bf16.mxu1 %vm709_vm1, %v1470_v28 }
 0x15b   : > { %2785 = vmatprep.subr.bf16.mxu1 %v3042_v42 }
 0x15e   : > { %2786 = vmatpush3.bf16.msra.mxu1 %v3042_v42 }
 0x15f   : > { %2795 = vmatprep.subr.bf16.mxu1 %v3043_v52 }
 0x161   : > { %2788 = vmatmul.mubr.msk.bf16.vlgmr.msra.gmra.mrb[0].mxu1 %vm709_vm1, %v1471_v56 }
 0x162   : > { %2796 = vmatpush3.bf16.msra.mxu1 %v3043_v52  ;;  %2791 = vmatprep.mubr.msk.bf16.mxu1 %vm709_vm1, %v1472_v60 }
 0x163   : > { %2797 = vmatprep.subr.bf16.mxu1 %v3044_v59 }
 0x166   : > { %2798 = vmatpush3.bf16.msra.mxu1 %v3044_v59  ;;  %v3060_v59 = vld [vmem:[%s3835_s7 + $0x8] sm:$0xff]  }
 0x167   : > { %2799 = vmatprep.subr.bf16.mxu1 %v3045_v61 }
 0x169   : > { %2792 = vmatmul.mubr.msk.bf16.gmra.mrb[4].mxu1 %vm709_vm1, %v1473_v1 }
 0x16a   : > { %2800 = vmatpush3.bf16.msra.mxu1 %v3045_v61  ;;  %2803 = vmatprep.mubr.msk.bf16.mxu1 %vm709_vm1, %v1600_v4 }
 0x16b   : > { %2801 = vmatprep.subr.bf16.mxu1 %v3046_v3 }
 0x16e   : > { %2802 = vmatpush3.bf16.msra.mxu1 %v3046_v3 }
 0x16f   : > { %2811 = vmatprep.subr.bf16.mxu1 %v3047_v5 }
 0x171   : > { %2804 = vmatmul.mubr.msk.bf16.vlgmr.msra.gmra.mrb[0].mxu1 %vm709_vm1, %v1601_v7 }
 0x172   : > { %2812 = vmatpush3.bf16.msra.mxu1 %v3047_v5  ;;  %2807 = vmatprep.mubr.msk.bf16.mxu1 %vm709_vm1, %v1602_v19  ;;  %v3061_v19 = vld [vmem:[%s3242_s29] sm:$0xff]  }
 0x173   : > { %2813 = vmatprep.subr.bf16.mxu1 %v3048_v8 }
 0x176   : > { %2814 = vmatpush3.bf16.msra.mxu1 %v3048_v8 }
 0x177   : > { %2815 = vmatprep.subr.bf16.mxu1 %v3049_v29 }
 0x179   : > { %2808 = vmatmul.mubr.msk.bf16.gmra.mrb[4].mxu1 %vm709_vm1, %v1603_v27  ;;  %v3064_v27 = vld [vmem:[%s3242_s29 + $0x18] sm:$0xff]  }
 0x17a   : > { %2816 = vmatpush3.bf16.msra.mxu1 %v3049_v29  ;;  %2819 = vmatprep.mubr.msk.bf16.mxu1 %vm709_vm1, %v1730_v51  ;;  %v1733_v51 = vpack.c.bf16 %v1729_v46, %v3538_v2  ;;  %v3057_v2 = vld [vmem:[%s3833_s5 + $0x10] sm:$0xff]   ;;  %v3062_v29 = vld [vmem:[%s3242_s29 + $0x8] sm:$0xff]   ;;  %s325_s29 = scalar_lea.vmem [#allocation3], %s2357_s23 }
 0x17b   : > { %2817 = vmatprep.subr.bf16.mxu1 %v3050_v37  ;;  %2847 = vmatprep.subr.bf16.mxu0 %v3057_v2  ;;  %s2291_s25 = sshll.u32 %s325_s29, 4  ;;  %s3783_s25 = int_to_ptr.vmem [resolvable:$true] %s2291_s25 }
 0x17c   : > { %2848 = vmatpush3.bf16.msra.mxu0 %v3057_v2  ;;  %s3065_s14 = scalar_lea.vmem %s3783_s25, 1024  ;;  %p3072_p0 = scmp.lt.s32.totalorder %s3783_s25, %s3070_s17 }
 0x17d   : > { %p3066_p11 = scmp.ne.s32.totalorder %s3783_s25, %s3065_s14  ;;  %p3073_p1 = scmp.lt.s32.totalorder %s3071_s21, %s3065_s14 }
 0x17e   : > { %2818 = vmatpush3.bf16.msra.mxu1 %v3050_v37  ;;  %v2532_v37 = vld [vmem:[%s3834_s6] ss:$0 sm:$0xff] }
 0x17f   : > { %2827 = vmatprep.subr.bf16.mxu1 %v3051_v38  ;;  %p3067_p12 = pnand %p3066_p11, %p3221_p5  ;;  %p3074_p2 = por %p3073_p1, %p3072_p0 }
 0x181   : > { %2820 = vmatmul.mubr.msk.bf16.vlgmr.msra.gmra.mrb[0].mxu1 %vm709_vm1, %v1731_v47  ;;  %v1859_v47 = vld [vmem:[#allocation2 + $0x261] sm:$0xff]  ;;  %p3068_p13 = pneg %p3067_p12 }
 0x182   : > { %2828 = vmatpush3.bf16.msra.mxu1 %v3051_v38  ;;  %2823 = vmatprep.mubr.msk.bf16.mxu1 %vm709_vm1, %v1732_v6  ;;  %v1863_v63 = vpack.c.bf16 %v1859_v47, %v3609_v50  ;;  %v3058_v6 = vld [vmem:[%s3833_s5 + $0x18] sm:$0xff]   ;;  %v2541_v38 = vld [vmem:[%s3836_s8] ss:$0 sm:$0xff] }
 0x183   : > { %2829 = vmatprep.subr.bf16.mxu1 %v3052_v43  ;;  %2849 = vmatprep.subr.bf16.mxu0 %v3058_v6  ;;  %p3075_p3 = pnand %p3074_p2, %p3068_p13 }
 0x184   : > { %2850 = vmatpush3.bf16.msra.mxu0 %v3058_v6 }
 0x185   : > { %2859 = vmatprep.subr.bf16.mxu0 %v3059_v20 }
 0x186   : > { %2830 = vmatpush3.bf16.msra.mxu1 %v3052_v43  ;;  %v2885_v43 = vadd.f32 %v2541_v38, %v2532_v37 }
 0x187   : > { %2831 = vmatprep.subr.bf16.mxu1 %v3053_v41 }
 0x189   : > { %2824 = vmatmul.mubr.msk.bf16.gmra.mrb[4].mxu1 %vm709_vm1, %v1733_v51 }
 0x18a   : > { %2832 = vmatpush3.bf16.msra.mxu1 %v3053_v41  ;;  %2835 = vmatprep.mubr.msk.bf16.mxu1 %vm709_vm1, %v1860_v35 }
 0x18b   : > { %2833 = vmatprep.subr.bf16.mxu1 %v3054_v44 }
 0x18e   : > { %2834 = vmatpush3.bf16.msra.mxu1 %v3054_v44 }
 0x191   : > { %2836 = vmatmul.mubr.msk.bf16.vlgmr.msra.gmra.mrb[0].mxu1 %vm709_vm1, %v1861_v31 }
 0x192   : > { %2839 = vmatprep.mubr.msk.bf16.mxu1 %vm709_vm1, %v1862_v57  ;;  %v2531_v57 = vld [vmem:[%s3832_s4] ss:$0 sm:$0xff] }
 0x199   : > { %2840 = vmatmul.mubr.msk.bf16.gmra.mrb[4].mxu1 %vm709_vm1, %v1863_v63 }
 0x203   : > { %v2725_v25 = vpop.f32.mrb[32].mxu0 }
 0x204   : > { %v1041_v26 = vpop.f32.mrb[33].mxu0 }
 0x205   : > { %v2726_v30 = vpop.f32.mrb[34].mxu0 }
 0x206   : > { %v1044_v31 = vpop.f32.mrb[35].mxu0 }
 0x20b   : > { %v2729_v35 = vpop.f32.mrb[36].mxu0 }
 0x20c   : > { %v1057_v39 = vpop.f32.mrb[37].mxu0 }
 0x20d   : > { %v2730_v48 = vpop.f32.mrb[38].mxu0 }
 0x20e   : > { %v1060_v49 = vpop.f32.mrb[39].mxu0 }
 0x264   : > { %v2837_v50 = vpop.f32.mrb[0].mxu1 }
 0x265   : > { %v2871_v10 = vadd.f32 %v2837_v50, %v2725_v25  ;;  %v1943_v11 = vpop.f32.mrb[1].mxu1 }
 0x266   : > { %v2872_v12 = vadd.f32 %v1943_v11, %v1041_v26  ;;  %v2838_v13 = vpop.f32.mrb[2].mxu1 }
 0x267   : > { %v1991_v14 = vadd.f32 %v2871_v10, %v2531_v57  ;;  %v2873_v15 = vadd.f32 %v2838_v13, %v2726_v30  ;;  %v1946_v16 = vpop.f32.mrb[3].mxu1 }
 0x268   : > { %v1989_v17 = vadd.f32 %v2872_v12, %v2531_v57  ;;  %v2874_v18 = vadd.f32 %v1946_v16, %v1044_v31 }
 0x269   : > { %v1992_v21 = vadd.f32 %v2873_v15, %v2531_v57  ;;  %v1999_v23 = vmax.f32 %v1991_v14, 0.0 }
 0x26a   : > { %v1990_v22 = vadd.f32 %v2874_v18, %v2531_v57  ;;  %v1997_v33 = vmax.f32 %v1989_v17, 0.0 }
 0x26b   : > { %v2000_v32 = vmax.f32 %v1992_v21, 0.0 }
 0x26c   : > { %v1998_v34 = vmax.f32 %v1990_v22, 0.0  ;;  %v2841_v36 = vpop.f32.mrb[4].mxu1 }
 0x26d   : > { %v2006_v40 = vpack.c.bf16 %v2000_v32, %v1999_v23  ;;  %v2875_v42 = vadd.f32 %v2841_v36, %v2729_v35  ;;  %v1959_v28 = vpop.f32.mrb[5].mxu1 }
 0x26e   : > { %v2005_v52 = vpack.c.bf16 %v1998_v34, %v1997_v33  ;;  %v2876_v53 = vadd.f32 %v1959_v28, %v1057_v39  ;;  %v2842_v54 = vpop.f32.mrb[6].mxu1 }
 0x26f   : > { %v1995_v55 = vadd.f32 %v2875_v42, %v2531_v57  ;;  %v2877_v56 = vadd.f32 %v2842_v54, %v2730_v48  ;;  %v1962_v58 = vpop.f32.mrb[7].mxu1 }
 0x270   : > { %v1993_v60 = vadd.f32 %v2876_v53, %v2531_v57  ;;  %v2878_v61 = vadd.f32 %v1962_v58, %v1060_v49  ;;  %2851 = vmatprep.mubr.msk.bf16.mxu0 %vm709_vm1, %v2005_v52 }
 0x271   : > { %v1996_v62 = vadd.f32 %v2877_v56, %v2531_v57  ;;  %2852 = vmatmul.mubr.msk.bf16.vlgmr.msra.gmra.mrb[40].mxu0 %vm709_vm1, %v2006_v40  ;;  %v2003_v1 = vmax.f32 %v1995_v55, 0.0 }
 0x272   : > { %v1994_v0 = vadd.f32 %v2878_v61, %v2531_v57  ;;  %2860 = vmatpush3.bf16.msra.mxu0 %v3059_v20  ;;  %v2001_v4 = vmax.f32 %v1993_v60, 0.0 }
 0x273   : > { %v2004_v3 = vmax.f32 %v1996_v62, 0.0  ;;  %2861 = vmatprep.subr.bf16.mxu0 %v3060_v59 }
 0x274   : > { %v2002_v5 = vmax.f32 %v1994_v0, 0.0 }
 0x275   : > { %v2008_v7 = vpack.c.bf16 %v2004_v3, %v2003_v1 }
 0x276   : > { %v2007_v8 = vpack.c.bf16 %v2002_v5, %v2001_v4  ;;  %2862 = vmatpush3.bf16.msra.mxu0 %v3060_v59 }
 0x278   : > { %2855 = vmatprep.mubr.msk.bf16.mxu0 %vm709_vm1, %v2007_v8 }
 0x279   : > { %2856 = vmatmul.mubr.msk.bf16.gmra.mrb[44].mxu0 %vm709_vm1, %v2008_v7 }
 0x27a   : > { %2863 = vmatprep.mubr.msk.bf16.mxu0 %vm467_vm0, %v3061_v19 }
 0x281   : > { %2864 = vmatmul.mubr.msk.bf16.vlgmr.msra.gmra.mrb[40].mxu0 %vm467_vm0, %v3062_v29 }
 0x282   : > { %2867 = vmatprep.mubr.msk.bf16.mxu0 %vm467_vm0, %v3063_v9 }
 0x289   : > { %2868 = vmatmul.mubr.msk.bf16.gmra.mrb[44].mxu0 %vm467_vm0, %v3064_v27 }
 0x354   : > { %v2865_v41 = vpop.f32.mrb[40].mxu0 }
 0x355   : > { %v2879_v46 = vadd.f32 %v2865_v41, %v2532_v37  ;;  %v2222_v51 = vpop.f32.mrb[41].mxu0 }
 0x356   : > { %v2881_v44 = vadd.f32 %v2532_v37, %v2222_v51  ;;  %v2866_v45 = vpop.f32.mrb[42].mxu0 }
 0x357   : > { %v2880_v47 = vadd.f32 %v2879_v46, %v2541_v38  ;;  %v2884_v63 = vadd.f32 %v2885_v43, %v2866_v45  ;;  %v2225_v24 = vpop.f32.mrb[43].mxu0 }
 0x358   : > { %v2882_v2 = vadd.f32 %v2881_v44, %v2541_v38  ;;  %v2886_v6 = vadd.f32 %v2885_v43, %v2225_v24 }
 0x359   : > { %v2263_v20 = vmax.f32 %v2880_v47, 0.0  ;;  %v2264_v25 = vmax.f32 %v2884_v63, 0.0 }
 0x35a   : > { %v2261_v26 = vmax.f32 %v2882_v2, 0.0  ;;  %v2262_v30 = vmax.f32 %v2886_v6, 0.0 }
 0x35b   : > { %2271 = vst [vmem:[%s325_s29 + $0x10] sm:$0xff] %v2263_v20  ;;  %2272 = vst [vmem:[%s325_s29 + $0x18] sm:$0xff] %v2264_v25 }
 0x35c   : > { %2269 = vst [vmem:[%s325_s29] sm:$0xff] %v2261_v26  ;;  %2270 = vst [vmem:[%s325_s29 + $0x8] sm:$0xff] %v2262_v30  ;;  %v2869_v31 = vpop.f32.mrb[44].mxu0 }
 0x35d   : > { %v2888_v35 = vadd.f32 %v2885_v43, %v2869_v31  ;;  %v2238_v39 = vpop.f32.mrb[45].mxu0 }
 0x35e   : > { %v2890_v48 = vadd.f32 %v2885_v43, %v2238_v39  ;;  %v2870_v49 = vpop.f32.mrb[46].mxu0 }
 0x35f   : > { %v2267_v50 = vmax.f32 %v2888_v35, 0.0  ;;  %v2892_v57 = vadd.f32 %v2885_v43, %v2870_v49  ;;  %v2241_v10 = vpop.f32.mrb[47].mxu0 }
 0x360   : > { %v2265_v11 = vmax.f32 %v2890_v48, 0.0  ;;  %v2894_v12 = vadd.f32 %v2885_v43, %v2241_v10 }
 0x361   : > { %2275 = vst [vmem:[%s325_s29 + $0x30] sm:$0xff] %v2267_v50  ;;  %v2268_v13 = vmax.f32 %v2892_v57, 0.0 }
 0x362   : > { %2273 = vst [vmem:[%s325_s29 + $0x20] sm:$0xff] %v2265_v11  ;;  %v2266_v14 = vmax.f32 %v2894_v12, 0.0 }
 0x363   : > { %2276 = vst [vmem:[%s325_s29 + $0x38] sm:$0xff] %v2268_v13 }
 0x364   : > { %2274 = vst [vmem:[%s325_s29 + $0x28] sm:$0xff] %v2266_v14 }
 0x365   : > { %3078 = shalt.err (!%p3075_p3)
}
 0x366   : > { %s3079_s22 = scalar_lea.hbm %s3781_s28, 1024  ;;  %s3083_s24 = scalar_lea.hbm %s3837_s9, 2048 }
 0x367   : > { %p3080_p4 = scmp.ne.s32.totalorder %s3781_s28, %s3079_s22  ;;  %p3084_p9 = scmp.lt.u32.totalorder %s3781_s28, %s3837_s9 }
 0x368   : > { %p3085_p10 = scmp.lt.u32.totalorder %s3083_s24, %s3079_s22  ;;  %p3087_p12 = scmp.lt.u32.totalorder %s3079_s22, %s3781_s28 }
 0x369   : > { %p3081_p7 = pnand %p3080_p4, %p3221_p5 }
 0x36a   : > { %p3086_p11 = por %p3085_p10, %p3084_p9 }
 0x36b   : > { %p3082_p8 = pneg %p3081_p7 }
 0x36c   : > { %p3088_p13 = por %p3087_p12, %p3086_p11 }
 0x36e   : > { %p3089_p0 = pnand %p3088_p13, %p3082_p8 }
 0x370   : > { %3092 = shalt.err (!%p3089_p0)
}
 0x371   : > { %s3131_s14 = smov 128   ;;  %s3132_s16 = smov 8  }
 0x372   : > { %2959 = dma.vmem_to_hbm [thread:$0]  (%p3221_p5), %s3783_s25, 1024, %s3781_s28, %s3787_s13, %s3131_s14, %s3131_s14, %s3132_s16  }
 0x373 PF: > { %p2965_p1 = scmp.ge.s32.totalorder %s3127_s12, 2  ;;  %s2306_s17 = sand.u32 1, %s3115_s30  }
 0x374   : > { %s2307_s21 = scalar_lea.sflag [#allocation4], %s2306_s17 }
 0x375   : > { %p2962_p2 = pnand %p2965_p1, %p3225_p6 }
 0x377   : > { %3110 = dma.done.wait (!%p2962_p2), %s2307_s21, 1024  }
 0x378   : > { %3112 = vsyncadd (!%p2962_p2), %s2307_s21, 4294966272  ;;  %p19_p3 = scmp.ge.s32.totalorder %s3208_s15, 4   ;;  %s3840_s30 = smov %s3119_s10 }
 0x379   : > { %s3841_s10 = smov %s3123_s11  ;;  %s3842_s11 = smov %s3219_s18 }
 0x37a   : > { %s3843_s12 = smov %s3208_s15  ;;  %21 = sbr.rel (!%p19_p3) target bundleno = 3 (0x3), region = 105 }
 0x381   :  { %2312 = vsyncpa [#allocation4], 1 }
 0x382   :  { %2314 = vsyncpa [#allocation4 + $0x1], 1 }

</bundles_post_ra>
